<compile_context>
chip_gen: v5e
topology: v5e:2x2
jax: 0.10.0
libtpu: 0.0.40
codegen_flags: <defaults>
</compile_context>

<pallas_src>
import jax
import jax.numpy as jnp
from jax.experimental import pallas as pl
from jax.experimental.pallas import tpu as pltpu

INPUT_DIM = 28 * 28    # 784
HIDDEN_DIM = 300
HIDDEN_PAD = 384       # next multiple of 128
Z_DIM = 2


def vae_kernel(x_ref, w1e_ref, b1e_ref, wml_ref, bml_ref, eps_ref,
               w1d_ref, b1d_ref, w2d_ref, b2d_ref,
               y_ref, mean_ref, logvar_ref):
    # ---- GaussianEncoder ----
    # fc1 (bf16 weights, f32 accumulate on MXU) + tanh
    x = x_ref[...].astype(jnp.bfloat16)
    h = jnp.tanh(
        jnp.dot(x, w1e_ref[...], preferred_element_type=jnp.float32)
        + b1e_ref[...]
    )
    # dropout: identity in eval mode

    # fused mean/logvar heads: one (HIDDEN_PAD, 2*Z_DIM) matmul
    ml = jnp.dot(h, wml_ref[...], preferred_element_type=jnp.float32) + bml_ref[...]
    mean = ml[:, :Z_DIM]
    logvar = ml[:, Z_DIM:]

    stddev = jnp.exp(0.5 * logvar)
    z = mean + stddev * eps_ref[...]

    # ---- BernoulliDecoder ----
    # fc1 has K=2: do it on the VPU as two broadcast FMAs instead of the MXU.
    hd = jnp.tanh(
        z[:, 0:1] * w1d_ref[0:1, :]
        + z[:, 1:2] * w1d_ref[1:2, :]
        + b1d_ref[...]
    )
    # dropout: identity in eval mode

    logits = jnp.dot(hd.astype(jnp.bfloat16), w2d_ref[...],
                     preferred_element_type=jnp.float32) + b2d_ref[...]
    y_ref[...] = jax.nn.sigmoid(logits)
    mean_ref[...] = mean
    logvar_ref[...] = logvar


def vae_forward(x, packed, eps):
    """packed = (w1e_bf16, b1e, wml, bml, w1d, b1d, w2d_bf16, b2d), padded."""
    B = x.shape[0]
    w1e, b1e, wml, bml, w1d, b1d, w2d, b2d = packed

    vmem = pl.BlockSpec(memory_space=pltpu.MemorySpace.VMEM)
    y, mean, logvar = pl.pallas_call(
        vae_kernel,
        out_shape=(
            jax.ShapeDtypeStruct((B, INPUT_DIM), jnp.float32),   # y
            jax.ShapeDtypeStruct((B, Z_DIM), jnp.float32),       # mean
            jax.ShapeDtypeStruct((B, Z_DIM), jnp.float32),       # logvar
        ),
        in_specs=[vmem] * 10,
        out_specs=(vmem, vmem, vmem),
    )(x, w1e, b1e, wml, bml, eps, w1d, b1d, w2d, b2d)

    return y, mean, logvar


def init_params(key):
    """Deterministic PyTorch-style (uniform +/- 1/sqrt(fan_in)) init, unpadded."""
    ks = jax.random.split(key, 10)

    def linear(kw, kb, fan_in, fan_out):
        bound = 1.0 / (fan_in ** 0.5)
        w = jax.random.uniform(kw, (fan_in, fan_out), jnp.float32, -bound, bound)
        b = jax.random.uniform(kb, (1, fan_out), jnp.float32, -bound, bound)
        return w, b

    w1e, b1e = linear(ks[0], ks[1], INPUT_DIM, HIDDEN_DIM)   # encoder.fc1
    wm, bm = linear(ks[2], ks[3], HIDDEN_DIM, Z_DIM)          # encoder.fc2_mean
    wl, bl = linear(ks[4], ks[5], HIDDEN_DIM, Z_DIM)          # encoder.fc2_logvar
    w1d, b1d = linear(ks[6], ks[7], Z_DIM, HIDDEN_DIM)        # decoder.fc1
    w2d, b2d = linear(ks[8], ks[9], HIDDEN_DIM, INPUT_DIM)    # decoder.fc2
    return (w1e, b1e, wm, bm, wl, bl, w1d, b1d, w2d, b2d)


def pack_params(params):
    """Pad hidden dim 300->384, fuse mean/logvar heads, bf16 the big weights."""
    w1e, b1e, wm, bm, wl, bl, w1d, b1d, w2d, b2d = params
    pad_h = HIDDEN_PAD - HIDDEN_DIM

    # encoder fc1: (784, 300) -> (784, 384) bf16 ; bias (1, 384)
    w1e_p = jnp.pad(w1e, ((0, 0), (0, pad_h))).astype(jnp.bfloat16)
    b1e_p = jnp.pad(b1e, ((0, 0), (0, pad_h)))

    # fused encoder heads: (384, 2*Z_DIM) f32 ; bias (1, 2*Z_DIM)
    wml = jnp.pad(jnp.concatenate([wm, wl], axis=1), ((0, pad_h), (0, 0)))
    bml = jnp.concatenate([bm, bl], axis=1)

    # decoder fc1: (2, 300) -> (2, 384) f32 (used on VPU) ; bias (1, 384)
    w1d_p = jnp.pad(w1d, ((0, 0), (0, pad_h)))
    b1d_p = jnp.pad(b1d, ((0, 0), (0, pad_h)))

    # decoder fc2: (300, 784) -> (384, 784) bf16
    w2d_p = jnp.pad(w2d, ((0, pad_h), (0, 0))).astype(jnp.bfloat16)

    return (w1e_p, b1e_p, wml, bml, w1d_p, b1d_p, w2d_p, b2d)


def vae_reference(x, packed, eps):
    """Pure-JAX reference (eval mode) using the same packed/bf16 weights."""
    w1e, b1e, wml, bml, w1d, b1d, w2d, b2d = packed
    w1e = w1e.astype(jnp.float32)
    w2d = w2d.astype(jnp.float32)
    h = jnp.tanh(x @ w1e + b1e)
    ml = h @ wml + bml
    mean, logvar = ml[:, :Z_DIM], ml[:, Z_DIM:]
    z = mean + jnp.exp(0.5 * logvar) * eps
    hd = jnp.tanh(z @ w1d + b1d)
    y = jax.nn.sigmoid(hd @ w2d + b2d)
    return y, mean, logvar


if __name__ == "__main__":
    key = jax.random.PRNGKey(0)
    k_param, k_x, k_eps = jax.random.split(key, 3)

    B = 8
    params = init_params(k_param)
    packed = pack_params(params)
    x = jax.random.uniform(k_x, (B, INPUT_DIM), jnp.float32)   # MNIST-like in [0,1)
    eps = jax.random.normal(k_eps, (B, Z_DIM), jnp.float32)    # torch.randn_like(stddev)

    y, mean, logvar = jax.jit(vae_forward)(x, packed, eps)
    jax.block_until_ready((y, mean, logvar))

    # sanity check against pure-JAX reference (bf16 weights -> loosened tolerance)
    y_ref, mean_ref, logvar_ref = vae_reference(x, packed, eps)
    assert jnp.allclose(y, y_ref, atol=2e-2), "y mismatch"
    assert jnp.allclose(mean, mean_ref, atol=2e-2), "mean mismatch"
    assert jnp.allclose(logvar, logvar_ref, atol=2e-2), "logvar mismatch"

    print("KERNEL_OK")
</pallas_src>

<mosaic_0001>
module attributes {stable_mosaic.version = 11 : i64} {
  func.func @vae_kernel(%arg0: memref<8x784xf32, #tpu.memory_space<vmem>>, %arg1: memref<784x384xbf16, #tpu.memory_space<vmem>>, %arg2: memref<1x384xf32, #tpu.memory_space<vmem>>, %arg3: memref<384x4xf32, #tpu.memory_space<vmem>>, %arg4: memref<1x4xf32, #tpu.memory_space<vmem>>, %arg5: memref<8x2xf32, #tpu.memory_space<vmem>>, %arg6: memref<2x384xf32, #tpu.memory_space<vmem>>, %arg7: memref<1x384xf32, #tpu.memory_space<vmem>>, %arg8: memref<384x784xbf16, #tpu.memory_space<vmem>>, %arg9: memref<1x784xf32, #tpu.memory_space<vmem>>, %arg10: memref<8x784xf32, #tpu.memory_space<vmem>>, %arg11: memref<8x2xf32, #tpu.memory_space<vmem>>, %arg12: memref<8x2xf32, #tpu.memory_space<vmem>>) attributes {dimension_semantics = [], scalar_prefetch = 0 : i64, scratch_operands = 0 : i64, tpu.core_type = #tpu.core_type<tc>} {
    %c0 = arith.constant 0 : index
    %c0_0 = arith.constant 0 : index
    %0 = vector.load %arg0[%c0, %c0_0] : memref<8x784xf32, #tpu.memory_space<vmem>>, vector<8x784xf32>
    %1 = arith.truncf %0 : vector<8x784xf32> to vector<8x784xbf16>
    %c0_1 = arith.constant 0 : index
    %c0_2 = arith.constant 0 : index
    %2 = vector.load %arg1[%c0_1, %c0_2] : memref<784x384xbf16, #tpu.memory_space<vmem>>, vector<784x384xbf16>
    %cst = arith.constant dense<0.000000e+00> : vector<8x384xf32>
    %3 = tpu.matmul %1, %2, %cst {dimension_numbers = #tpu.dot_dimension_numbers<[1], [0], [0], [1], [0, 0, 1, 1], [], []>} : vector<8x784xbf16>, vector<784x384xbf16>, vector<8x384xf32> -> vector<8x384xf32>
    %c0_3 = arith.constant 0 : index
    %c0_4 = arith.constant 0 : index
    %4 = vector.load %arg2[%c0_3, %c0_4] : memref<1x384xf32, #tpu.memory_space<vmem>>, vector<1x384xf32>
    %5 = vector.broadcast %4 : vector<1x384xf32> to vector<8x384xf32>
    %6 = arith.addf %3, %5 : vector<8x384xf32>
    %7 = math.tanh %6 : vector<8x384xf32>
    %c0_5 = arith.constant 0 : index
    %c0_6 = arith.constant 0 : index
    %8 = vector.load %arg3[%c0_5, %c0_6] : memref<384x4xf32, #tpu.memory_space<vmem>>, vector<384x4xf32>
    %cst_7 = arith.constant dense<0.000000e+00> : vector<8x4xf32>
    %9 = tpu.matmul %7, %8, %cst_7 {dimension_numbers = #tpu.dot_dimension_numbers<[1], [0], [0], [1], [0, 0, 1, 1], [], []>} : vector<8x384xf32>, vector<384x4xf32>, vector<8x4xf32> -> vector<8x4xf32>
    %c0_8 = arith.constant 0 : index
    %c0_9 = arith.constant 0 : index
    %10 = vector.load %arg4[%c0_8, %c0_9] : memref<1x4xf32, #tpu.memory_space<vmem>>, vector<1x4xf32>
    %11 = vector.broadcast %10 : vector<1x4xf32> to vector<8x4xf32>
    %12 = arith.addf %9, %11 : vector<8x4xf32>
    %13 = vector.extract_strided_slice %12 {offsets = [0, 0], sizes = [8, 2], strides = [1, 1]} : vector<8x4xf32> to vector<8x2xf32>
    %14 = vector.extract_strided_slice %12 {offsets = [0, 2], sizes = [8, 2], strides = [1, 1]} : vector<8x4xf32> to vector<8x2xf32>
    %cst_10 = arith.constant 5.000000e-01 : f32
    %15 = vector.broadcast %cst_10 : f32 to vector<8x2xf32>
    %16 = arith.mulf %15, %14 : vector<8x2xf32>
    %17 = math.exp %16 : vector<8x2xf32>
    %c0_11 = arith.constant 0 : index
    %c0_12 = arith.constant 0 : index
    %18 = vector.load %arg5[%c0_11, %c0_12] : memref<8x2xf32, #tpu.memory_space<vmem>>, vector<8x2xf32>
    %19 = arith.mulf %17, %18 : vector<8x2xf32>
    %20 = arith.addf %13, %19 : vector<8x2xf32>
    %21 = vector.extract_strided_slice %20 {offsets = [0, 0], sizes = [8, 1], strides = [1, 1]} : vector<8x2xf32> to vector<8x1xf32>
    %c0_13 = arith.constant 0 : index
    %c0_14 = arith.constant 0 : index
    %22 = vector.load %arg6[%c0_13, %c0_14] : memref<2x384xf32, #tpu.memory_space<vmem>>, vector<1x384xf32>
    %23 = vector.broadcast %21 : vector<8x1xf32> to vector<8x384xf32>
    %24 = vector.broadcast %22 : vector<1x384xf32> to vector<8x384xf32>
    %25 = arith.mulf %23, %24 : vector<8x384xf32>
    %26 = vector.extract_strided_slice %20 {offsets = [0, 1], sizes = [8, 1], strides = [1, 1]} : vector<8x2xf32> to vector<8x1xf32>
    %c1 = arith.constant 1 : index
    %c0_15 = arith.constant 0 : index
    %27 = vector.load %arg6[%c1, %c0_15] : memref<2x384xf32, #tpu.memory_space<vmem>>, vector<1x384xf32>
    %28 = vector.broadcast %26 : vector<8x1xf32> to vector<8x384xf32>
    %29 = vector.broadcast %27 : vector<1x384xf32> to vector<8x384xf32>
    %30 = arith.mulf %28, %29 : vector<8x384xf32>
    %31 = arith.addf %25, %30 : vector<8x384xf32>
    %c0_16 = arith.constant 0 : index
    %c0_17 = arith.constant 0 : index
    %32 = vector.load %arg7[%c0_16, %c0_17] : memref<1x384xf32, #tpu.memory_space<vmem>>, vector<1x384xf32>
    %33 = vector.broadcast %32 : vector<1x384xf32> to vector<8x384xf32>
    %34 = arith.addf %31, %33 : vector<8x384xf32>
    %35 = math.tanh %34 : vector<8x384xf32>
    %36 = arith.truncf %35 : vector<8x384xf32> to vector<8x384xbf16>
    %c0_18 = arith.constant 0 : index
    %c0_19 = arith.constant 0 : index
    %37 = vector.load %arg8[%c0_18, %c0_19] : memref<384x784xbf16, #tpu.memory_space<vmem>>, vector<384x784xbf16>
    %cst_20 = arith.constant dense<0.000000e+00> : vector<8x784xf32>
    %38 = tpu.matmul %36, %37, %cst_20 {dimension_numbers = #tpu.dot_dimension_numbers<[1], [0], [0], [1], [0, 0, 1, 1], [], []>} : vector<8x384xbf16>, vector<384x784xbf16>, vector<8x784xf32> -> vector<8x784xf32>
    %c0_21 = arith.constant 0 : index
    %c0_22 = arith.constant 0 : index
    %39 = vector.load %arg9[%c0_21, %c0_22] : memref<1x784xf32, #tpu.memory_space<vmem>>, vector<1x784xf32>
    %40 = vector.broadcast %39 : vector<1x784xf32> to vector<8x784xf32>
    %41 = arith.addf %38, %40 : vector<8x784xf32>
    %42 = arith.negf %41 : vector<8x784xf32>
    %43 = math.exp %42 : vector<8x784xf32>
    %cst_23 = arith.constant 1.000000e+00 : f32
    %44 = vector.broadcast %cst_23 : f32 to vector<8x784xf32>
    %45 = arith.addf %44, %43 : vector<8x784xf32>
    %46 = arith.divf %44, %45 : vector<8x784xf32>
    %c0_24 = arith.constant 0 : index
    %c0_25 = arith.constant 0 : index
    %47 = vector.load %arg10[%c0_24, %c0_25] : memref<8x784xf32, #tpu.memory_space<vmem>>, vector<8x784xf32>
    tpu.vector_store %arg10[%c0_24, %c0_25], %46 {strides = array<i32>} : memref<8x784xf32, #tpu.memory_space<vmem>>, vector<8x784xf32>,
    %c0_26 = arith.constant 0 : index
    %c0_27 = arith.constant 0 : index
    %48 = vector.load %arg11[%c0_26, %c0_27] : memref<8x2xf32, #tpu.memory_space<vmem>>, vector<8x2xf32>
    tpu.vector_store %arg11[%c0_26, %c0_27], %13 {strides = array<i32>} : memref<8x2xf32, #tpu.memory_space<vmem>>, vector<8x2xf32>,
    %c0_28 = arith.constant 0 : index
    %c0_29 = arith.constant 0 : index
    %49 = vector.load %arg12[%c0_28, %c0_29] : memref<8x2xf32, #tpu.memory_space<vmem>>, vector<8x2xf32>
    tpu.vector_store %arg12[%c0_28, %c0_29], %14 {strides = array<i32>} : memref<8x2xf32, #tpu.memory_space<vmem>>, vector<8x2xf32>,
    return
  }
}

</mosaic_0001>

<bundles_post_ra>
// kernel: vae_forward.1
= control target key start
LH: loop header
LB: loop body
LE: loop exit
PB: predicated region body
PF: predicated region fallthrough
CT: control target
= control target key end

     0   :  { %vm1042_vm0 = vcmask 130048   ;;  %s6922_s0 = inlined_call_operand.vmem [shape: f32[8,784], index: 0, kind: input, shape index: {}]   ;;  %s6923_s1 = inlined_call_operand.vmem [shape: bf16[784,384], index: 1, kind: input, shape index: {}]   ;;  %s6924_s2 = inlined_call_operand.vmem [shape: f32[1,384], index: 2, kind: input, shape index: {}]   ;;  %s6925_s3 = inlined_call_operand.vmem [shape: f32[384,4], index: 3, kind: input, shape index: {}]   ;;  %s6926_s4 = inlined_call_operand.vmem [shape: f32[1,4], index: 4, kind: input, shape index: {}]   ;;  %s6927_s5 = inlined_call_operand.vmem [shape: f32[8,2], index: 5, kind: input, shape index: {}]   ;;  %s6928_s6 = inlined_call_operand.vmem [shape: f32[2,384], index: 6, kind: input, shape index: {}]   ;;  %s6929_s7 = inlined_call_operand.vmem [shape: f32[1,384], index: 7, kind: input, shape index: {}]   ;;  %s6930_s8 = inlined_call_operand.vmem [shape: bf16[384,784], index: 8, kind: input, shape index: {}]   ;;  %s6931_s9 = inlined_call_operand.vmem [shape: f32[1,784], index: 9, kind: input, shape index: {}]   ;;  %s6932_s10 = inlined_call_operand.hbm [shape: f32[8,784], index: 10, kind: output, shape index: {0}]   ;;  %s6933_s11 = inlined_call_operand.vmem [shape: f32[8,2], index: 11, kind: output, shape index: {1}]   ;;  %s6934_s12 = inlined_call_operand.vmem [shape: f32[8,2], index: 12, kind: output, shape index: {2}]  }
   0x1   :  { %v3102_v0 = vld [vmem:[%s6923_s1 + $0xa8] sm:$0xf]  ;;  %v4309_v1 = vld [vmem:[%s6923_s1 + $0xb0] sm:$0xf0]  ;;  %v3090_v9 = vld [vmem:[%s6923_s1 + $0x90] sm:$0xf] }
   0x2   :  { %v3198_v2 = vld [vmem:[%s6923_s1 + $0x168] sm:$0xf]  ;;  %v3103_v3 = vor.u32 %v4309_v1, %v3102_v0  ;;  %v4333_v4 = vld [vmem:[%s6923_s1 + $0x170] sm:$0xf0]  ;;  %v4306_v10 = vld [vmem:[%s6923_s1 + $0x98] sm:$0xf0] }
   0x3   :  { %v3390_v5 = vld [vmem:[%s6923_s1 + $0x2e8] sm:$0xf]  ;;  %v4381_v6 = vld [vmem:[%s6923_s1 + $0x2f0] sm:$0xf0]  ;;  %v3199_v7 = vor.u32 %v4333_v4, %v3198_v2  ;;  %v3186_v11 = vld [vmem:[%s6923_s1 + $0x150] sm:$0xf]  ;;  %v3091_v12 = vor.u32 %v4306_v10, %v3090_v9 }
   0x4   :  { %v3391_v8 = vor.u32 %v4381_v6, %v3390_v5  ;;  %1046 = vmatpush.bf16.msra.mxu0 %v3103_v3  ;;  %v4330_v13 = vld [vmem:[%s6923_s1 + $0x158] sm:$0xf0]  ;;  %v3378_v14 = vld [vmem:[%s6923_s1 + $0x2d0] sm:$0xf]  ;;  %v3294_v18 = vld [vmem:[%s6923_s1 + $0x228] sm:$0xf] }
   0x5   :  { %v4378_v15 = vld [vmem:[%s6923_s1 + $0x2d8] sm:$0xf0]  ;;  %1059 = vmatpush.bf16.msra.mxu1 %v3199_v7  ;;  %v3187_v16 = vor.u32 %v4330_v13, %v3186_v11  ;;  %v4357_v19 = vld [vmem:[%s6923_s1 + $0x230] sm:$0xf0]  ;;  %v3078_v20 = vld [vmem:[%s6923_s1 + $0x78] sm:$0xf] }
   0x6   :  { %1085 = vmatpush.bf16.msra.mxu3 %v3391_v8  ;;  %v3379_v17 = vor.u32 %v4378_v15, %v3378_v14  ;;  %v3295_v21 = vor.u32 %v4357_v19, %v3294_v18  ;;  %v4303_v22 = vld [vmem:[%s6923_s1 + $0x80] sm:$0xf0]  ;;  %v3174_v23 = vld [vmem:[%s6923_s1 + $0x138] sm:$0xf]  ;;  %v3282_v27 = vld [vmem:[%s6923_s1 + $0x210] sm:$0xf] }
   0x7   :  { %v4327_v24 = vld [vmem:[%s6923_s1 + $0x140] sm:$0xf0]  ;;  %v3366_v25 = vld [vmem:[%s6923_s1 + $0x2b8] sm:$0xf]  ;;  %v3079_v28 = vor.u32 %v4303_v22, %v3078_v20  ;;  %v4354_v29 = vld [vmem:[%s6923_s1 + $0x218] sm:$0xf0] }
   0x8   :  { %v4375_v26 = vld [vmem:[%s6923_s1 + $0x2c0] sm:$0xf0]  ;;  %1047 = vmatpush.bf16.msra.mxu0 %v3091_v12  ;;  %1072 = vmatpush.bf16.msra.mxu2 %v3295_v21  ;;  %v3066_v30 = vld [vmem:[%s6923_s1 + $0x60] sm:$0xf]  ;;  %v4300_v31 = vld [vmem:[%s6923_s1 + $0x68] sm:$0xf0]  ;;  %v3175_v32 = vor.u32 %v4327_v24, %v3174_v23  ;;  %v3283_v34 = vor.u32 %v4354_v29, %v3282_v27 }
   0x9   :  { %1060 = vmatpush.bf16.msra.mxu1 %v3187_v16  ;;  %v3367_v33 = vor.u32 %v4375_v26, %v3366_v25  ;;  %v3162_v35 = vld [vmem:[%s6923_s1 + $0x120] sm:$0xf]  ;;  %v4324_v36 = vld [vmem:[%s6923_s1 + $0x128] sm:$0xf0]  ;;  %v3270_v39 = vld [vmem:[%s6923_s1 + $0x1f8] sm:$0xf]  ;;  %v3067_v41 = vor.u32 %v4300_v31, %v3066_v30 }
   0xa   :  { %1086 = vmatpush.bf16.msra.mxu3 %v3379_v17  ;;  %v3354_v37 = vld [vmem:[%s6923_s1 + $0x2a0] sm:$0xf]  ;;  %v4372_v38 = vld [vmem:[%s6923_s1 + $0x2a8] sm:$0xf0]  ;;  %v4351_v40 = vld [vmem:[%s6923_s1 + $0x200] sm:$0xf0]  ;;  %v3163_v45 = vor.u32 %v4324_v36, %v3162_v35 }
   0xb   :  { %v3271_v42 = vor.u32 %v4351_v40, %v3270_v39  ;;  %v3054_v43 = vld [vmem:[%s6923_s1 + $0x48] sm:$0xf]  ;;  %v4297_v44 = vld [vmem:[%s6923_s1 + $0x50] sm:$0xf0]  ;;  %v3355_v46 = vor.u32 %v4372_v38, %v3354_v37  ;;  %v3258_v48 = vld [vmem:[%s6923_s1 + $0x1e0] sm:$0xf] }
   0xc   :  { %1048 = vmatpush.bf16.msra.mxu0 %v3079_v28  ;;  %1073 = vmatpush.bf16.msra.mxu2 %v3283_v34  ;;  %v3150_v47 = vld [vmem:[%s6923_s1 + $0x108] sm:$0xf]  ;;  %v4348_v49 = vld [vmem:[%s6923_s1 + $0x1e8] sm:$0xf0]  ;;  %v4321_v50 = vld [vmem:[%s6923_s1 + $0x110] sm:$0xf0]  ;;  %v3055_v53 = vor.u32 %v4297_v44, %v3054_v43 }
   0xd   :  { %1061 = vmatpush.bf16.msra.mxu1 %v3175_v32  ;;  %v3342_v51 = vld [vmem:[%s6923_s1 + $0x288] sm:$0xf]  ;;  %v4369_v52 = vld [vmem:[%s6923_s1 + $0x290] sm:$0xf0]  ;;  %v3259_v54 = vor.u32 %v4348_v49, %v3258_v48  ;;  %v3042_v55 = vld [vmem:[%s6923_s1 + $0x30] sm:$0xf]  ;;  %v3151_v57 = vor.u32 %v4321_v50, %v3150_v47 }
   0xe   :  { %1087 = vmatpush.bf16.msra.mxu3 %v3367_v33  ;;  %v4294_v56 = vld [vmem:[%s6923_s1 + $0x38] sm:$0xf0]  ;;  %v3343_v58 = vor.u32 %v4369_v52, %v3342_v51  ;;  %v3138_v59 = vld [vmem:[%s6923_s1 + $0xf0] sm:$0xf]  ;;  %v3246_v60 = vld [vmem:[%s6923_s1 + $0x1c8] sm:$0xf] }
   0xf   :  { %v4345_v61 = vld [vmem:[%s6923_s1 + $0x1d0] sm:$0xf0]  ;;  %v4318_v62 = vld [vmem:[%s6923_s1 + $0xf8] sm:$0xf0]  ;;  %v3330_v63 = vld [vmem:[%s6923_s1 + $0x270] sm:$0xf]  ;;  %v3043_v1 = vor.u32 %v4294_v56, %v3042_v55 }
  0x10   :  { %1049 = vmatpush.bf16.msra.mxu0 %v3067_v41  ;;  %1074 = vmatpush.bf16.msra.mxu2 %v3271_v42  ;;  %v4366_v0 = vld [vmem:[%s6923_s1 + $0x278] sm:$0xf0]  ;;  %v3247_v2 = vor.u32 %v4345_v61, %v3246_v60  ;;  %v3030_v3 = vld [vmem:[%s6923_s1 + $0x18] sm:$0xf]  ;;  %v4291_v4 = vld [vmem:[%s6923_s1 + $0x20] sm:$0xf0]  ;;  %v3139_v5 = vor.u32 %v4318_v62, %v3138_v59 }
  0x11   :  { %1062 = vmatpush.bf16.msra.mxu1 %v3163_v45  ;;  %v3331_v6 = vor.u32 %v4366_v0, %v3330_v63  ;;  %v3126_v7 = vld [vmem:[%s6923_s1 + $0xd8] sm:$0xf]  ;;  %v3234_v8 = vld [vmem:[%s6923_s1 + $0x1b0] sm:$0xf]  ;;  %v4342_v9 = vld [vmem:[%s6923_s1 + $0x1b8] sm:$0xf0]  ;;  %v3031_v13 = vor.u32 %v4291_v4, %v3030_v3 }
  0x12   :  { %1088 = vmatpush.bf16.msra.mxu3 %v3355_v46  ;;  %v4315_v10 = vld [vmem:[%s6923_s1 + $0xe0] sm:$0xf0]  ;;  %v3318_v11 = vld [vmem:[%s6923_s1 + $0x258] sm:$0xf]  ;;  %v3235_v14 = vor.u32 %v4342_v9, %v3234_v8  ;;  %v3018_v15 = vld [vmem:[%s6923_s1] sm:$0xf] }
  0x13   :  { %v4363_v12 = vld [vmem:[%s6923_s1 + $0x260] sm:$0xf0]  ;;  %v4288_v16 = vld [vmem:[%s6923_s1 + $0x8] sm:$0xf0]  ;;  %v3114_v17 = vld [vmem:[%s6923_s1 + $0xc0] sm:$0xf]  ;;  %v3127_v18 = vor.u32 %v4315_v10, %v3126_v7 }
  0x14   :  { %1050 = vmatpush.bf16.msra.mxu0 %v3055_v53  ;;  %1075 = vmatpush.bf16.msra.mxu2 %v3259_v54  ;;  %v3319_v19 = vor.u32 %v4363_v12, %v3318_v11  ;;  %v4312_v20 = vld [vmem:[%s6923_s1 + $0xc8] sm:$0xf0]  ;;  %v3222_v21 = vld [vmem:[%s6923_s1 + $0x198] sm:$0xf]  ;;  %v4339_v22 = vld [vmem:[%s6923_s1 + $0x1a0] sm:$0xf0]  ;;  %v3019_v29 = vor.u32 %v4288_v16, %v3018_v15 }
  0x15   :  { %1063 = vmatpush.bf16.msra.mxu1 %v3151_v57  ;;  %v3306_v23 = vld [vmem:[%s6923_s1 + $0x240] sm:$0xf]  ;;  %v4360_v24 = vld [vmem:[%s6923_s1 + $0x248] sm:$0xf0]  ;;  %v3486_v25 = vld [vmem:[%s6923_s1 + $0x3a8] sm:$0xf]  ;;  %v3223_v30 = vor.u32 %v4339_v22, %v3222_v21  ;;  %v3115_v33 = vor.u32 %v4312_v20, %v3114_v17 }
  0x16   :  { %1089 = vmatpush.bf16.msra.mxu3 %v3343_v58  ;;  %v4405_v26 = vld [vmem:[%s6923_s1 + $0x3b0] sm:$0xf0]  ;;  %v3582_v27 = vld [vmem:[%s6923_s1 + $0x468] sm:$0xf]  ;;  %v4308_v31 = vld [vmem:[%s6923_s1 + $0xac] sm:$0xf]  ;;  %v3307_v34 = vor.u32 %v4360_v24, %v3306_v23 }
  0x17   :  { %v4429_v28 = vld [vmem:[%s6923_s1 + $0x470] sm:$0xf0]  ;;  %v3104_v32 = vld [vmem:[%s6923_s1 + $0xb4] sm:$0xf0]  ;;  %v3210_v35 = vld [vmem:[%s6923_s1 + $0x180] sm:$0xf]  ;;  %v3487_v37 = vor.u32 %v4405_v26, %v3486_v25 }
  0x18   :  { %1051 = vmatpush.bf16.msra.mxu0 %v3043_v1  ;;  %1076 = vmatpush.bf16.msra.mxu2 %v3247_v2  ;;  %v4336_v36 = vld [vmem:[%s6923_s1 + $0x188] sm:$0xf0]  ;;  %v3583_v38 = vor.u32 %v4429_v28, %v3582_v27  ;;  %v3474_v39 = vld [vmem:[%s6923_s1 + $0x390] sm:$0xf]  ;;  %v3594_v40 = vld [vmem:[%s6923_s1 + $0x480] sm:$0xf]  ;;  %v3107_v42 = vor.u32 %v4308_v31, %v3104_v32 }
  0x19   :  { %1064 = vmatpush.bf16.msra.mxu1 %v3139_v5  ;;  %v4432_v41 = vld [vmem:[%s6923_s1 + $0x488] sm:$0xf0]  ;;  %v4402_v43 = vld [vmem:[%s6923_s1 + $0x398] sm:$0xf0]  ;;  %v3570_v44 = vld [vmem:[%s6923_s1 + $0x450] sm:$0xf]  ;;  %v3211_v46 = vor.u32 %v4336_v36, %v3210_v35 }
  0x1a   :  { %1090 = vmatpush.bf16.msra.mxu3 %v3331_v6  ;;  %v4426_v45 = vld [vmem:[%s6923_s1 + $0x458] sm:$0xf0]  ;;  %v4305_v47 = vld [vmem:[%s6923_s1 + $0x94] sm:$0xf]  ;;  %v3092_v48 = vld [vmem:[%s6923_s1 + $0x9c] sm:$0xf0]  ;;  %v3595_v50 = vor.u32 %v4432_v41, %v3594_v40  ;;  %v3475_v53 = vor.u32 %v4402_v43, %v3474_v39 }
  0x1b   :  { %v42_v49 = vld [vmem:[%s6922_s0 + $0x10] sm:$0xff]  ;;  %v4332_v51 = vld [vmem:[%s6923_s1 + $0x16c] sm:$0xf]  ;;  %v3200_v52 = vld [vmem:[%s6923_s1 + $0x174] sm:$0xf0]  ;;  %v3571_v54 = vor.u32 %v4426_v45, %v3570_v44  ;;  %v3095_v57 = vor.u32 %v4305_v47, %v3092_v48 }
  0x1c   :  { %1052 = vmatpush.bf16.msra.mxu0 %v3031_v13  ;;  %1077 = vmatpush.bf16.msra.mxu2 %v3235_v14  ;;  %v3462_v55 = vld [vmem:[%s6923_s1 + $0x378] sm:$0xf]  ;;  %v4399_v56 = vld [vmem:[%s6923_s1 + $0x380] sm:$0xf0]  ;;  %v4998_v58 = vpack.c.bf16 %v42_v49, %v42_v49  ;;  %v4302_v62 = vld [vmem:[%s6923_s1 + $0x7c] sm:$0xf]  ;;  %v3203_v0 = vor.u32 %v4332_v51, %v3200_v52 }
  0x1d   :  { %1065 = vmatpush.bf16.msra.mxu1 %v3127_v18  ;;  %v3558_v59 = vld [vmem:[%s6923_s1 + $0x438] sm:$0xf]  ;;  %v4423_v60 = vld [vmem:[%s6923_s1 + $0x440] sm:$0xf0]  ;;  %v3080_v63 = vld [vmem:[%s6923_s1 + $0x84] sm:$0xf0]  ;;  %v3463_v4 = vor.u32 %v4399_v56, %v3462_v55 }
  0x1e   :  { %1091 = vmatpush.bf16.msra.mxu3 %v3319_v19  ;;  %v40_v61 = vld [vmem:[%s6922_s0] sm:$0xff]  ;;  %v4329_v2 = vld [vmem:[%s6923_s1 + $0x154] sm:$0xf]  ;;  %v3559_v5 = vor.u32 %v4423_v60, %v3558_v59  ;;  %v41_v7 = vld [vmem:[%s6922_s0 + $0x8] sm:$0xff]  ;;  %v3083_v9 = vor.u32 %v4302_v62, %v3080_v63 }
  0x1f   :  { %v5015_v1 = vpack.c.bf16 %v40_v61, %v40_v61  ;;  %v3188_v3 = vld [vmem:[%s6923_s1 + $0x15c] sm:$0xf0]  ;;  %v43_v8 = vld [vmem:[%s6922_s0 + $0x18] sm:$0xff]  ;;  %v4396_v10 = vld [vmem:[%s6923_s1 + $0x368] sm:$0xf0]  ;;  %v5042_v13 = vpack.c.bf16 %v41_v7, %v41_v7 }
  0x20   :  { %1053 = vmatpush.bf16.msra.mxu0 %v3019_v29  ;;  %1078 = vmatpush.bf16.msra.mxu2 %v3223_v30  ;;  %v3450_v6 = vld [vmem:[%s6923_s1 + $0x360] sm:$0xf]  ;;  %v4420_v12 = vld [vmem:[%s6923_s1 + $0x428] sm:$0xf0]  ;;  %v5044_v14 = vpack.c.bf16 %v43_v8, %v43_v8  ;;  %v4299_v15 = vld [vmem:[%s6923_s1 + $0x64] sm:$0xf]  ;;  %v3191_v17 = vor.u32 %v4329_v2, %v3188_v3 }
  0x21   :  { %1066 = vmatpush.bf16.msra.mxu1 %v3115_v33  ;;  %v3546_v11 = vld [vmem:[%s6923_s1 + $0x420] sm:$0xf]  ;;  %v3068_v16 = vld [vmem:[%s6923_s1 + $0x6c] sm:$0xf0]  ;;  %v4326_v18 = vld [vmem:[%s6923_s1 + $0x13c] sm:$0xf]  ;;  %v3451_v20 = vor.u32 %v4396_v10, %v3450_v6 }
  0x22   :  { %1092 = vmatpush.bf16.msra.mxu3 %v3307_v34  ;;  %v3176_v19 = vld [vmem:[%s6923_s1 + $0x144] sm:$0xf0]  ;;  %v3547_v21 = vor.u32 %v4420_v12, %v3546_v11  ;;  %v3071_v23 = vor.u32 %v4299_v15, %v3068_v16  ;;  %v4393_v24 = vld [vmem:[%s6923_s1 + $0x350] sm:$0xf0]  ;;  %v4296_v27 = vld [vmem:[%s6923_s1 + $0x4c] sm:$0xf] }
  0x23   :  { %1054 = vmatmul.bf16.vlgmr.msra.gmra.mxu0 %v5015_v1  ;;  %v3438_v22 = vld [vmem:[%s6923_s1 + $0x348] sm:$0xf]  ;;  %v4417_v26 = vld [vmem:[%s6923_s1 + $0x410] sm:$0xf0]  ;;  %v3056_v28 = vld [vmem:[%s6923_s1 + $0x54] sm:$0xf0]  ;;  %v3179_v29 = vor.u32 %v4326_v18, %v3176_v19 }
  0x24   :  { %1098 = vmatpush.bf16.msrb.mxu0 %v3487_v37  ;;  %1079 = vmatpush.bf16.msra.mxu2 %v3211_v46  ;;  %v3534_v25 = vld [vmem:[%s6923_s1 + $0x408] sm:$0xf]  ;;  %v4323_v30 = vld [vmem:[%s6923_s1 + $0x124] sm:$0xf]  ;;  %v3164_v31 = vld [vmem:[%s6923_s1 + $0x12c] sm:$0xf0]  ;;  %v3439_v32 = vor.u32 %v4393_v24, %v3438_v22  ;;  %v3059_v35 = vor.u32 %v4296_v27, %v3056_v28 }
  0x25   :  { %1111 = vmatpush.bf16.msrb.mxu1 %v3583_v38  ;;  %1093 = vmatmul.bf16.vlgmr.msra.gmra.mxu3 %v5044_v14  ;;  %v3535_v33 = vor.u32 %v4417_v26, %v3534_v25  ;;  %v3426_v34 = vld [vmem:[%s6923_s1 + $0x330] sm:$0xf]  ;;  %v4390_v36 = vld [vmem:[%s6923_s1 + $0x338] sm:$0xf0]  ;;  %v4293_v39 = vld [vmem:[%s6923_s1 + $0x34] sm:$0xf]  ;;  %v3167_v41 = vor.u32 %v4323_v30, %v3164_v31 }
  0x26   :  { %1137 = vmatpush.bf16.msrb.mxu3 %v3107_v42  ;;  %1067 = vmatmul.bf16.vlgmr.msra.gmra.mxu1 %v5042_v13  ;;  %v3522_v37 = vld [vmem:[%s6923_s1 + $0x3f0] sm:$0xf]  ;;  %v4414_v38 = vld [vmem:[%s6923_s1 + $0x3f8] sm:$0xf0]  ;;  %v3044_v40 = vld [vmem:[%s6923_s1 + $0x3c] sm:$0xf0]  ;;  %v3427_v45 = vor.u32 %v4390_v36, %v3426_v34 }
  0x27   :  { %1080 = vmatmul.bf16.vlgmr.msra.gmra.mxu2 %v4998_v58  ;;  %v46_v42 = vld [vmem:[%s6922_s0 + $0x30] sm:$0xff]  ;;  %v4320_v43 = vld [vmem:[%s6923_s1 + $0x10c] sm:$0xf]  ;;  %v3152_v44 = vld [vmem:[%s6923_s1 + $0x114] sm:$0xf0]  ;;  %v3523_v46 = vor.u32 %v4414_v38, %v3522_v37  ;;  %v3047_v48 = vor.u32 %v4293_v39, %v3044_v40 }
  0x28   :  { %1131 = vmatpush.bf16.msrb.mxu2 %v3595_v50  ;;  %1099 = vmatpush.bf16.msrb.mxu0 %v3475_v53  ;;  %v3414_v47 = vld [vmem:[%s6923_s1 + $0x318] sm:$0xf]  ;;  %v4387_v49 = vld [vmem:[%s6923_s1 + $0x320] sm:$0xf0]  ;;  %v5124_v52 = vpack.c.bf16 %v46_v42, %v46_v42  ;;  %v4290_v53 = vld [vmem:[%s6923_s1 + $0x1c] sm:$0xf]  ;;  %v3155_v55 = vor.u32 %v4320_v43, %v3152_v44 }
  0x29   :  { %1112 = vmatpush.bf16.msrb.mxu1 %v3571_v54  ;;  %v3510_v50 = vld [vmem:[%s6923_s1 + $0x3d8] sm:$0xf]  ;;  %v4411_v51 = vld [vmem:[%s6923_s1 + $0x3e0] sm:$0xf0]  ;;  %v3032_v54 = vld [vmem:[%s6923_s1 + $0x24] sm:$0xf0]  ;;  %v3415_v59 = vor.u32 %v4387_v49, %v3414_v47 }
  0x2a   :  { %1138 = vmatpush.bf16.msrb.mxu3 %v3095_v57  ;;  %v4317_v56 = vld [vmem:[%s6923_s1 + $0xf4] sm:$0xf]  ;;  %v3140_v57 = vld [vmem:[%s6923_s1 + $0xfc] sm:$0xf0]  ;;  %v3511_v60 = vor.u32 %v4411_v51, %v3510_v50  ;;  %v4384_v62 = vld [vmem:[%s6923_s1 + $0x308] sm:$0xf0] }
  0x2b   :  { %v3402_v61 = vld [vmem:[%s6923_s1 + $0x300] sm:$0xf]  ;;  %v4408_v2 = vld [vmem:[%s6923_s1 + $0x3c8] sm:$0xf0]  ;;  %v4287_v3 = vld [vmem:[%s6923_s1 + $0x4] sm:$0xf] }
  0x2c   :  { %1150 = vmatpush.bf16.msra.mxu2 %v3203_v0  ;;  %1100 = vmatpush.bf16.msrb.mxu0 %v3463_v4  ;;  %v3498_v63 = vld [vmem:[%s6923_s1 + $0x3c0] sm:$0xf]  ;;  %v3035_v0 = vor.u32 %v4290_v53, %v3032_v54  ;;  %v3020_v4 = vld [vmem:[%s6923_s1 + $0xc] sm:$0xf0]  ;;  %v4356_v6 = vld [vmem:[%s6923_s1 + $0x22c] sm:$0xf]  ;;  %v3403_v12 = vor.u32 %v4384_v62, %v3402_v61 }
  0x2d   :  { %1113 = vmatpush.bf16.msrb.mxu1 %v3559_v5  ;;  %v3143_v5 = vor.u32 %v4317_v56, %v3140_v57  ;;  %v3296_v7 = vld [vmem:[%s6923_s1 + $0x234] sm:$0xf0]  ;;  %v4380_v8 = vld [vmem:[%s6923_s1 + $0x2ec] sm:$0xf]  ;;  %v3499_v15 = vor.u32 %v4408_v2, %v3498_v63  ;;  %v4314_v16 = vld [vmem:[%s6923_s1 + $0xdc] sm:$0xf]  ;;  %v3023_v19 = vor.u32 %v4287_v3, %v3020_v4 }
  0x2e   :  { %1139 = vmatpush.bf16.msrb.mxu3 %v3083_v9  ;;  %v3392_v9 = vld [vmem:[%s6923_s1 + $0x2f4] sm:$0xf0]  ;;  %v4404_v10 = vld [vmem:[%s6923_s1 + $0x3ac] sm:$0xf]  ;;  %v44_v18 = vld [vmem:[%s6922_s0 + $0x20] sm:$0xff] }
  0x2f   :  { %v3488_v11 = vld [vmem:[%s6923_s1 + $0x3b4] sm:$0xf0]  ;;  %v3395_v22 = vor.u32 %v4380_v8, %v3392_v9  ;;  %v4353_v24 = vld [vmem:[%s6923_s1 + $0x214] sm:$0xf]  ;;  %v3284_v25 = vld [vmem:[%s6923_s1 + $0x21c] sm:$0xf0]  ;;  %v5206_v31 = vpack.c.bf16 %v44_v18, %v44_v18 }
  0x30   :  { %1151 = vmatpush.bf16.msra.mxu2 %v3191_v17  ;;  %1101 = vmatpush.bf16.msrb.mxu0 %v3451_v20  ;;  %v3128_v17 = vld [vmem:[%s6923_s1 + $0xe4] sm:$0xf0]  ;;  %v3299_v20 = vor.u32 %v4356_v6, %v3296_v7  ;;  %v4377_v26 = vld [vmem:[%s6923_s1 + $0x2d4] sm:$0xf]  ;;  %v3380_v28 = vld [vmem:[%s6923_s1 + $0x2dc] sm:$0xf0] }
  0x31   :  { %1114 = vmatpush.bf16.msrb.mxu1 %v3547_v21  ;;  %v45_v21 = vld [vmem:[%s6922_s0 + $0x28] sm:$0xff]  ;;  %v3131_v27 = vor.u32 %v4314_v16, %v3128_v17  ;;  %v3476_v30 = vld [vmem:[%s6923_s1 + $0x39c] sm:$0xf0]  ;;  %v3584_v37 = vld [vmem:[%s6923_s1 + $0x474] sm:$0xf0]  ;;  %v3383_v38 = vor.u32 %v4377_v26, %v3380_v28 }
  0x32   :  { %1140 = vmatpush.bf16.msrb.mxu3 %v3071_v23  ;;  %v3491_v23 = vor.u32 %v4404_v10, %v3488_v11  ;;  %v5214_v34 = vpack.c.bf16 %v45_v21, %v45_v21  ;;  %v4428_v36 = vld [vmem:[%s6923_s1 + $0x46c] sm:$0xf]  ;;  %v4350_v40 = vld [vmem:[%s6923_s1 + $0x1fc] sm:$0xf]  ;;  %v3368_v44 = vld [vmem:[%s6923_s1 + $0x2c4] sm:$0xf0] }
  0x33   :  { %v4374_v42 = vld [vmem:[%s6923_s1 + $0x2bc] sm:$0xf]  ;;  %v3587_v47 = vor.u32 %v4428_v36, %v3584_v37  ;;  %v4425_v49 = vld [vmem:[%s6923_s1 + $0x454] sm:$0xf]  ;;  %v3572_v50 = vld [vmem:[%s6923_s1 + $0x45c] sm:$0xf0] }
  0x34   :  { %1152 = vmatpush.bf16.msra.mxu2 %v3179_v29  ;;  %1102 = vmatpush.bf16.msrb.mxu0 %v3439_v32  ;;  %v4401_v29 = vld [vmem:[%s6923_s1 + $0x394] sm:$0xf]  ;;  %v4311_v32 = vld [vmem:[%s6923_s1 + $0xc4] sm:$0xf]  ;;  %v3371_v51 = vor.u32 %v4374_v42, %v3368_v44  ;;  %v3356_v57 = vld [vmem:[%s6923_s1 + $0x2ac] sm:$0xf0]  ;;  %v3575_v61 = vor.u32 %v4425_v49, %v3572_v50 }
  0x35   :  { %1115 = vmatpush.bf16.msrb.mxu1 %v3535_v33  ;;  %v3116_v33 = vld [vmem:[%s6923_s1 + $0xcc] sm:$0xf0]  ;;  %v3479_v39 = vor.u32 %v4401_v29, %v3476_v30  ;;  %v4347_v54 = vld [vmem:[%s6923_s1 + $0x1e4] sm:$0xf]  ;;  %v4422_v63 = vld [vmem:[%s6923_s1 + $0x43c] sm:$0xf] }
  0x36   :  { %1141 = vmatpush.bf16.msrb.mxu3 %v3059_v35  ;;  %v3287_v35 = vor.u32 %v4353_v24, %v3284_v25  ;;  %v3119_v43 = vor.u32 %v4311_v32, %v3116_v33  ;;  %v4371_v56 = vld [vmem:[%s6923_s1 + $0x2a4] sm:$0xf]  ;;  %v4344_v4 = vld [vmem:[%s6923_s1 + $0x1cc] sm:$0xf]  ;;  %v3344_v7 = vld [vmem:[%s6923_s1 + $0x294] sm:$0xf0] }
  0x37   :  { %3604 = vmatmul.msk.bf16.vlgmr.msrb.gmra.mxu2 %vm1042_vm0, %v5124_v52  ;;  %v3359_v2 = vor.u32 %v4371_v56, %v3356_v57  ;;  %v4368_v6 = vld [vmem:[%s6923_s1 + $0x28c] sm:$0xf]  ;;  %v3440_v9 = vld [vmem:[%s6923_s1 + $0x354] sm:$0xf0]  ;;  %v4341_v11 = vld [vmem:[%s6923_s1 + $0x1b4] sm:$0xf] }
  0x38   :  { %1153 = vmatpush.bf16.msra.mxu2 %v3167_v41  ;;  %1103 = vmatpush.bf16.msrb.mxu0 %v3427_v45  ;;  %v3272_v41 = vld [vmem:[%s6923_s1 + $0x204] sm:$0xf0]  ;;  %v4398_v45 = vld [vmem:[%s6923_s1 + $0x37c] sm:$0xf]  ;;  %v4392_v8 = vld [vmem:[%s6923_s1 + $0x34c] sm:$0xf]  ;;  %v3347_v18 = vor.u32 %v4368_v6, %v3344_v7 }
  0x39   :  { %1116 = vmatpush.bf16.msrb.mxu1 %v3523_v46  ;;  %v3464_v46 = vld [vmem:[%s6923_s1 + $0x384] sm:$0xf0]  ;;  %v4419_v16 = vld [vmem:[%s6923_s1 + $0x424] sm:$0xf]  ;;  %v3548_v17 = vld [vmem:[%s6923_s1 + $0x42c] sm:$0xf0] }
  0x3a   :  { %1142 = vmatpush.bf16.msrb.mxu3 %v3047_v48  ;;  %v3275_v48 = vor.u32 %v4350_v40, %v3272_v41  ;;  %v3467_v53 = vor.u32 %v4398_v45, %v3464_v46  ;;  %v3332_v21 = vld [vmem:[%s6923_s1 + $0x27c] sm:$0xf0] }
  0x3c   :  { %1154 = vmatpush.bf16.msra.mxu2 %v3155_v55  ;;  %1104 = vmatpush.bf16.msrb.mxu0 %v3415_v59  ;;  %v3260_v55 = vld [vmem:[%s6923_s1 + $0x1ec] sm:$0xf0]  ;;  %v4395_v59 = vld [vmem:[%s6923_s1 + $0x364] sm:$0xf] }
  0x3d   :  { %1117 = vmatpush.bf16.msrb.mxu1 %v3511_v60  ;;  %v3452_v60 = vld [vmem:[%s6923_s1 + $0x36c] sm:$0xf0]  ;;  %v3263_v62 = vor.u32 %v4347_v54, %v3260_v55 }
  0x3e   :  { %1143 = vmatpush.bf16.msrb.mxu3 %v3035_v0  ;;  %v3560_v0 = vld [vmem:[%s6923_s1 + $0x444] sm:$0xf0]  ;;  %v3455_v3 = vor.u32 %v4395_v59, %v3452_v60 }
  0x3f   :  { %v3563_v10 = vor.u32 %v4422_v63, %v3560_v0 }
  0x40   :  { %1155 = vmatpush.bf16.msra.mxu2 %v3143_v5  ;;  %1105 = vmatpush.bf16.msrb.mxu0 %v3403_v12  ;;  %v3248_v5 = vld [vmem:[%s6923_s1 + $0x1d4] sm:$0xf0] }
  0x41   :  { %1118 = vmatpush.bf16.msrb.mxu1 %v3499_v15  ;;  %v3251_v12 = vor.u32 %v4344_v4, %v3248_v5  ;;  %v3236_v15 = vld [vmem:[%s6923_s1 + $0x1bc] sm:$0xf0] }
  0x42   :  { %1144 = vmatpush.bf16.msrb.mxu3 %v3023_v19  ;;  %v3443_v19 = vor.u32 %v4392_v8, %v3440_v9 }
  0x43   :  { %1106 = vmatmul.bf16.vlgmr.msrb.gmra.mxu0 %v5206_v31 }
  0x44   :  { %1163 = vmatpush.bf16.msra.mxu0 %v3299_v20  ;;  %1156 = vmatpush.bf16.msra.mxu2 %v3131_v27  ;;  %v4365_v20 = vld [vmem:[%s6923_s1 + $0x274] sm:$0xf] }
  0x45   :  { %1176 = vmatpush.bf16.msra.mxu1 %v3395_v22  ;;  %1145 = vmatmul.bf16.vlgmr.msrb.gmra.mxu3 %v5015_v1  ;;  %v4389_v22 = vld [vmem:[%s6923_s1 + $0x334] sm:$0xf] }
  0x46   :  { %1189 = vmatpush.bf16.msra.mxu3 %v3491_v23  ;;  %1119 = vmatmul.bf16.vlgmr.msrb.gmra.mxu1 %v5214_v34  ;;  %v3428_v23 = vld [vmem:[%s6923_s1 + $0x33c] sm:$0xf0] }
  0x48   :  { %1164 = vmatpush.bf16.msra.mxu0 %v3287_v35  ;;  %1157 = vmatpush.bf16.msra.mxu2 %v3119_v43 }
  0x49   :  { %1177 = vmatpush.bf16.msra.mxu1 %v3383_v38 }
  0x4a   :  { %1190 = vmatpush.bf16.msra.mxu3 %v3479_v39 }
  0x4b   :  { %1158 = vmatmul.bf16.vlgmr.msra.gmra.mxu2 %v5042_v13 }
  0x4c   :  { %1202 = vmatpush.bf16.msrb.mxu2 %v3587_v47  ;;  %1165 = vmatpush.bf16.msra.mxu0 %v3275_v48 }
  0x4d   :  { %1178 = vmatpush.bf16.msra.mxu1 %v3371_v51 }
  0x4e   :  { %1191 = vmatpush.bf16.msra.mxu3 %v3467_v53 }
  0x50   :  { %1203 = vmatpush.bf16.msrb.mxu2 %v3575_v61  ;;  %1166 = vmatpush.bf16.msra.mxu0 %v3263_v62 }
  0x51   :  { %1179 = vmatpush.bf16.msra.mxu1 %v3359_v2 }
  0x52   :  { %1192 = vmatpush.bf16.msra.mxu3 %v3455_v3 }
  0x53   :  { %18 = vsyncpa [#allocation3], 0  ;;  %v3551_v24 = vor.u32 %v4419_v16, %v3548_v17  ;;  %v3239_v25 = vor.u32 %v4341_v11, %v3236_v15  ;;  %v4416_v26 = vld [vmem:[%s6923_s1 + $0x40c] sm:$0xf]  ;;  %v3536_v27 = vld [vmem:[%s6923_s1 + $0x414] sm:$0xf0]  ;;  %v3335_v28 = vor.u32 %v4365_v20, %v3332_v21  ;;  %v3431_v29 = vor.u32 %v4389_v22, %v3428_v23 }
  0x54   :  { %1204 = vmatpush.bf16.msrb.mxu2 %v3563_v10  ;;  %1167 = vmatpush.bf16.msra.mxu0 %v3251_v12  ;;  %v4338_v30 = vld [vmem:[%s6923_s1 + $0x19c] sm:$0xf]  ;;  %v3224_v32 = vld [vmem:[%s6923_s1 + $0x1a4] sm:$0xf0]  ;;  %v3539_v38 = vor.u32 %v4416_v26, %v3536_v27  ;;  %v4335_v40 = vld [vmem:[%s6923_s1 + $0x184] sm:$0xf] }
  0x55   :  { %1180 = vmatpush.bf16.msra.mxu1 %v3347_v18  ;;  %v4362_v33 = vld [vmem:[%s6923_s1 + $0x25c] sm:$0xf]  ;;  %v3320_v35 = vld [vmem:[%s6923_s1 + $0x264] sm:$0xf0]  ;;  %v3227_v39 = vor.u32 %v4338_v30, %v3224_v32  ;;  %v4413_v41 = vld [vmem:[%s6923_s1 + $0x3f4] sm:$0xf] }
  0x56   :  { %1193 = vmatpush.bf16.msra.mxu3 %v3443_v19  ;;  %v4386_v36 = vld [vmem:[%s6923_s1 + $0x31c] sm:$0xf]  ;;  %v3416_v37 = vld [vmem:[%s6923_s1 + $0x324] sm:$0xf0]  ;;  %v3524_v42 = vld [vmem:[%s6923_s1 + $0x3fc] sm:$0xf0]  ;;  %v3323_v43 = vor.u32 %v4362_v33, %v3320_v35 }
  0x57   :  { %v3419_v44 = vor.u32 %v4386_v36, %v3416_v37  ;;  %v3212_v45 = vld [vmem:[%s6923_s1 + $0x18c] sm:$0xf0]  ;;  %v4359_v46 = vld [vmem:[%s6923_s1 + $0x244] sm:$0xf]  ;;  %v3527_v51 = vor.u32 %v4413_v41, %v3524_v42  ;;  %v4310_v53 = vld [vmem:[%s6923_s1 + $0xb8] sm:$0xf0] }
  0x58   :  { %1205 = vmatpush.bf16.msrb.mxu2 %v3551_v24  ;;  %1168 = vmatpush.bf16.msra.mxu0 %v3239_v25  ;;  %v3308_v47 = vld [vmem:[%s6923_s1 + $0x24c] sm:$0xf0]  ;;  %v4383_v48 = vld [vmem:[%s6923_s1 + $0x304] sm:$0xf]  ;;  %v4334_v55 = vld [vmem:[%s6923_s1 + $0x178] sm:$0xf0]  ;;  %v3215_v56 = vor.u32 %v4335_v40, %v3212_v45 }
  0x59   :  { %1181 = vmatpush.bf16.msra.mxu1 %v3335_v28  ;;  %v3404_v49 = vld [vmem:[%s6923_s1 + $0x30c] sm:$0xf0]  ;;  %v4410_v57 = vld [vmem:[%s6923_s1 + $0x3dc] sm:$0xf]  ;;  %v3512_v59 = vld [vmem:[%s6923_s1 + $0x3e4] sm:$0xf0]  ;;  %v3311_v60 = vor.u32 %v4359_v46, %v3308_v47 }
  0x5a   :  { %1194 = vmatpush.bf16.msra.mxu3 %v3431_v29  ;;  %v3110_v50 = vld [vmem:[%s6923_s1 + $0xb0] sm:$0xf]  ;;  %v3407_v61 = vor.u32 %v4383_v48, %v3404_v49  ;;  %v3098_v62 = vld [vmem:[%s6923_s1 + $0x98] sm:$0xf]  ;;  %v4307_v2 = vld [vmem:[%s6923_s1 + $0xa0] sm:$0xf0]  ;;  %v3515_v5 = vor.u32 %v4410_v57, %v3512_v59 }
  0x5b   :  { %v3206_v54 = vld [vmem:[%s6923_s1 + $0x170] sm:$0xf]  ;;  %v3111_v63 = vor.u32 %v4310_v53, %v3110_v50  ;;  %v4431_v3 = vld [vmem:[%s6923_s1 + $0x484] sm:$0xf]  ;;  %v3194_v6 = vld [vmem:[%s6923_s1 + $0x158] sm:$0xf]  ;;  %v3099_v17 = vor.u32 %v4307_v2, %v3098_v62 }
  0x5c   :  { %1206 = vmatpush.bf16.msrb.mxu2 %v3539_v38  ;;  %1169 = vmatpush.bf16.msra.mxu0 %v3227_v39  ;;  %v3207_v0 = vor.u32 %v4334_v55, %v3206_v54  ;;  %v3596_v4 = vld [vmem:[%s6923_s1 + $0x48c] sm:$0xf0]  ;;  %v4331_v7 = vld [vmem:[%s6923_s1 + $0x160] sm:$0xf0]  ;;  %v4358_v11 = vld [vmem:[%s6923_s1 + $0x238] sm:$0xf0] }
  0x5d   :  { %1182 = vmatpush.bf16.msra.mxu1 %v3323_v43  ;;  %v4407_v8 = vld [vmem:[%s6923_s1 + $0x3c4] sm:$0xf]  ;;  %v3500_v9 = vld [vmem:[%s6923_s1 + $0x3cc] sm:$0xf0]  ;;  %v3599_v12 = vor.u32 %v4431_v3, %v3596_v4  ;;  %v4382_v16 = vld [vmem:[%s6923_s1 + $0x2f8] sm:$0xf0]  ;;  %v3195_v18 = vor.u32 %v4331_v7, %v3194_v6 }
  0x5e   :  { %1195 = vmatpush.bf16.msra.mxu3 %v3419_v44  ;;  %v3302_v10 = vld [vmem:[%s6923_s1 + $0x230] sm:$0xf]  ;;  %v3086_v19 = vld [vmem:[%s6923_s1 + $0x80] sm:$0xf]  ;;  %v3503_v20 = vor.u32 %v4407_v8, %v3500_v9  ;;  %v4304_v21 = vld [vmem:[%s6923_s1 + $0x88] sm:$0xf0] }
  0x5f   :  { %v3398_v15 = vld [vmem:[%s6923_s1 + $0x2f0] sm:$0xf]  ;;  %v3182_v22 = vld [vmem:[%s6923_s1 + $0x140] sm:$0xf]  ;;  %v4328_v23 = vld [vmem:[%s6923_s1 + $0x148] sm:$0xf0]  ;;  %v3303_v24 = vor.u32 %v4358_v11, %v3302_v10  ;;  %v3087_v30 = vor.u32 %v4304_v21, %v3086_v19 }
  0x60   :  { %1207 = vmatpush.bf16.msrb.mxu2 %v3527_v51  ;;  %1170 = vmatpush.bf16.msra.mxu0 %v3215_v56  ;;  %v3290_v25 = vld [vmem:[%s6923_s1 + $0x218] sm:$0xf]  ;;  %v4355_v26 = vld [vmem:[%s6923_s1 + $0x220] sm:$0xf0]  ;;  %v3399_v27 = vor.u32 %v4382_v16, %v3398_v15  ;;  %v3183_v32 = vor.u32 %v4328_v23, %v3182_v22  ;;  %v3074_v33 = vld [vmem:[%s6923_s1 + $0x68] sm:$0xf] }
  0x61   :  { %1183 = vmatpush.bf16.msra.mxu1 %v3311_v60  ;;  %v3386_v28 = vld [vmem:[%s6923_s1 + $0x2d8] sm:$0xf]  ;;  %v4379_v29 = vld [vmem:[%s6923_s1 + $0x2e0] sm:$0xf0]  ;;  %v4301_v35 = vld [vmem:[%s6923_s1 + $0x70] sm:$0xf0]  ;;  %v3291_v38 = vor.u32 %v4355_v26, %v3290_v25 }
  0x62   :  { %1196 = vmatpush.bf16.msra.mxu3 %v3407_v61  ;;  %v3170_v36 = vld [vmem:[%s6923_s1 + $0x128] sm:$0xf]  ;;  %v4325_v37 = vld [vmem:[%s6923_s1 + $0x130] sm:$0xf0]  ;;  %v3278_v39 = vld [vmem:[%s6923_s1 + $0x200] sm:$0xf]  ;;  %v3387_v41 = vor.u32 %v4379_v29, %v3386_v28  ;;  %v3075_v44 = vor.u32 %v4301_v35, %v3074_v33 }
  0x63   :  { %1171 = vmatmul.bf16.vlgmr.msra.gmra.mxu0 %v4998_v58  ;;  %v4352_v40 = vld [vmem:[%s6923_s1 + $0x208] sm:$0xf0]  ;;  %v3374_v42 = vld [vmem:[%s6923_s1 + $0x2c0] sm:$0xf]  ;;  %v3171_v45 = vor.u32 %v4325_v37, %v3170_v36  ;;  %v3062_v46 = vld [vmem:[%s6923_s1 + $0x50] sm:$0xf] }
  0x64   :  { %1208 = vmatpush.bf16.msrb.mxu2 %v3515_v5  ;;  %1184 = vmatmul.bf16.vlgmr.msra.gmra.mxu1 %v5044_v14  ;;  %v4376_v43 = vld [vmem:[%s6923_s1 + $0x2c8] sm:$0xf0]  ;;  %v4298_v47 = vld [vmem:[%s6923_s1 + $0x58] sm:$0xf0]  ;;  %v3158_v48 = vld [vmem:[%s6923_s1 + $0x110] sm:$0xf]  ;;  %v3279_v50 = vor.u32 %v4352_v40, %v3278_v39 }
  0x65   :  { %1228 = vmatpush.bf16.msrb.mxu1 %v3111_v63  ;;  %1197 = vmatmul.bf16.vlgmr.msra.gmra.mxu3 %v5206_v31  ;;  %v4322_v49 = vld [vmem:[%s6923_s1 + $0x118] sm:$0xf0]  ;;  %v3266_v51 = vld [vmem:[%s6923_s1 + $0x1e8] sm:$0xf]  ;;  %v3375_v53 = vor.u32 %v4376_v43, %v3374_v42  ;;  %v4349_v54 = vld [vmem:[%s6923_s1 + $0x1f0] sm:$0xf0]  ;;  %v3063_v57 = vor.u32 %v4298_v47, %v3062_v46 }
  0x66   :  { %1241 = vmatpush.bf16.msrb.mxu3 %v3207_v0  ;;  %1222 = vmatpush.bf16.msrb.mxu0 %v3599_v12  ;;  %v3362_v55 = vld [vmem:[%s6923_s1 + $0x2a8] sm:$0xf]  ;;  %v4373_v56 = vld [vmem:[%s6923_s1 + $0x2b0] sm:$0xf0]  ;;  %v3159_v59 = vor.u32 %v4322_v49, %v3158_v48  ;;  %v3050_v60 = vld [vmem:[%s6923_s1 + $0x38] sm:$0xf]  ;;  %v3267_v0 = vor.u32 %v4349_v54, %v3266_v51 }
  0x67   :  { %v4295_v61 = vld [vmem:[%s6923_s1 + $0x40] sm:$0xf0]  ;;  %v3146_v62 = vld [vmem:[%s6923_s1 + $0xf8] sm:$0xf]  ;;  %v3254_v2 = vld [vmem:[%s6923_s1 + $0x1d0] sm:$0xf]  ;;  %v3363_v3 = vor.u32 %v4373_v56, %v3362_v55 }
  0x68   :  { %1209 = vmatpush.bf16.msrb.mxu2 %v3503_v20  ;;  %v4319_v63 = vld [vmem:[%s6923_s1 + $0x100] sm:$0xf0]  ;;  %v4346_v4 = vld [vmem:[%s6923_s1 + $0x1d8] sm:$0xf0]  ;;  %v3350_v5 = vld [vmem:[%s6923_s1 + $0x290] sm:$0xf]  ;;  %v3051_v7 = vor.u32 %v4295_v61, %v3050_v60 }
  0x69   :  { %1229 = vmatpush.bf16.msrb.mxu1 %v3099_v17  ;;  %v4370_v6 = vld [vmem:[%s6923_s1 + $0x298] sm:$0xf0]  ;;  %v3147_v8 = vor.u32 %v4319_v63, %v3146_v62  ;;  %v3038_v9 = vld [vmem:[%s6923_s1 + $0x20] sm:$0xf]  ;;  %v4292_v10 = vld [vmem:[%s6923_s1 + $0x28] sm:$0xf0]  ;;  %v3255_v15 = vor.u32 %v4346_v4, %v3254_v2 }
  0x6a   :  { %1242 = vmatpush.bf16.msrb.mxu3 %v3195_v18  ;;  %1254 = vmatpush.bf16.msra.mxu0 %v3303_v24  ;;  %v3134_v11 = vld [vmem:[%s6923_s1 + $0xe0] sm:$0xf]  ;;  %v4316_v12 = vld [vmem:[%s6923_s1 + $0xe8] sm:$0xf0]  ;;  %v3242_v16 = vld [vmem:[%s6923_s1 + $0x1b8] sm:$0xf]  ;;  %v3351_v17 = vor.u32 %v4370_v6, %v3350_v5  ;;  %v3039_v21 = vor.u32 %v4292_v10, %v3038_v9 }
  0x6b   :  { %1210 = vmatmul.bf16.vlgmr.msrb.gmra.mxu2 %v5214_v34  ;;  %v4343_v18 = vld [vmem:[%s6923_s1 + $0x1c0] sm:$0xf0]  ;;  %v3338_v19 = vld [vmem:[%s6923_s1 + $0x278] sm:$0xf]  ;;  %v3135_v22 = vor.u32 %v4316_v12, %v3134_v11  ;;  %v3026_v23 = vld [vmem:[%s6923_s1 + $0x8] sm:$0xf] }
  0x6c   :  { %1267 = vmatpush.bf16.msra.mxu2 %v3399_v27  ;;  %v4367_v20 = vld [vmem:[%s6923_s1 + $0x280] sm:$0xf0]  ;;  %v4289_v24 = vld [vmem:[%s6923_s1 + $0x10] sm:$0xf0]  ;;  %v3122_v25 = vld [vmem:[%s6923_s1 + $0xc8] sm:$0xf] }
  0x6d   :  { %1230 = vmatpush.bf16.msrb.mxu1 %v3087_v30  ;;  %v4313_v26 = vld [vmem:[%s6923_s1 + $0xd0] sm:$0xf0]  ;;  %v3494_v27 = vld [vmem:[%s6923_s1 + $0x3b0] sm:$0xf]  ;;  %v4406_v28 = vld [vmem:[%s6923_s1 + $0x3b8] sm:$0xf0]  ;;  %v3339_v35 = vor.u32 %v4367_v20, %v3338_v19  ;;  %v3027_v39 = vor.u32 %v4289_v24, %v3026_v23 }
  0x6e   :  { %1243 = vmatpush.bf16.msrb.mxu3 %v3183_v32  ;;  %1255 = vmatpush.bf16.msra.mxu0 %v3291_v38  ;;  %v3590_v29 = vld [vmem:[%s6923_s1 + $0x470] sm:$0xf]  ;;  %v4430_v30 = vld [vmem:[%s6923_s1 + $0x478] sm:$0xf0]  ;;  %v3243_v32 = vor.u32 %v4343_v18, %v3242_v16  ;;  %v3230_v33 = vld [vmem:[%s6923_s1 + $0x1a0] sm:$0xf]  ;;  %v3123_v40 = vor.u32 %v4313_v26, %v3122_v25 }
  0x6f   :  { %v4340_v36 = vld [vmem:[%s6923_s1 + $0x1a8] sm:$0xf0]  ;;  %v3326_v37 = vld [vmem:[%s6923_s1 + $0x260] sm:$0xf]  ;;  %v3591_v42 = vor.u32 %v4430_v30, %v3590_v29  ;;  %v3482_v43 = vld [vmem:[%s6923_s1 + $0x398] sm:$0xf] }
  0x70   :  { %1268 = vmatpush.bf16.msra.mxu2 %v3387_v41  ;;  %v4364_v38 = vld [vmem:[%s6923_s1 + $0x268] sm:$0xf0]  ;;  %v3495_v41 = vor.u32 %v4406_v28, %v3494_v27  ;;  %v4427_v46 = vld [vmem:[%s6923_s1 + $0x460] sm:$0xf0]  ;;  %v3231_v47 = vor.u32 %v4340_v36, %v3230_v33  ;;  %v3218_v48 = vld [vmem:[%s6923_s1 + $0x188] sm:$0xf] }
  0x71   :  { %1231 = vmatpush.bf16.msrb.mxu1 %v3075_v44  ;;  %v4403_v44 = vld [vmem:[%s6923_s1 + $0x3a0] sm:$0xf0]  ;;  %v3327_v49 = vor.u32 %v4364_v38, %v3326_v37  ;;  %v3314_v51 = vld [vmem:[%s6923_s1 + $0x248] sm:$0xf]  ;;  %v4433_v55 = vld [vmem:[%s6923_s1 + $0x490] sm:$0xf0] }
  0x72   :  { %1244 = vmatpush.bf16.msrb.mxu3 %v3171_v45  ;;  %1256 = vmatpush.bf16.msra.mxu0 %v3279_v50  ;;  %v3578_v45 = vld [vmem:[%s6923_s1 + $0x458] sm:$0xf]  ;;  %v4337_v50 = vld [vmem:[%s6923_s1 + $0x190] sm:$0xf0]  ;;  %v3602_v54 = vld [vmem:[%s6923_s1 + $0x488] sm:$0xf]  ;;  %v3483_v56 = vor.u32 %v4403_v44, %v3482_v43 }
  0x73   :  { %3605 = vmatmul.msk.bf16.vlgmr.msrb.gmra.mxu0 %vm1042_vm0, %v5124_v52  ;;  %v4400_v60 = vld [vmem:[%s6923_s1 + $0x388] sm:$0xf0]  ;;  %v3566_v61 = vld [vmem:[%s6923_s1 + $0x440] sm:$0xf]  ;;  %v3219_v63 = vor.u32 %v4337_v50, %v3218_v48  ;;  %v3603_v2 = vor.u32 %v4433_v55, %v3602_v54  ;;  %v3458_v6 = vld [vmem:[%s6923_s1 + $0x368] sm:$0xf] }
  0x74   :  { %1269 = vmatpush.bf16.msra.mxu2 %v3375_v53  ;;  %v4361_v53 = vld [vmem:[%s6923_s1 + $0x250] sm:$0xf0]  ;;  %v4424_v62 = vld [vmem:[%s6923_s1 + $0x448] sm:$0xf0]  ;;  %v3446_v10 = vld [vmem:[%s6923_s1 + $0x350] sm:$0xf] }
  0x75   :  { %1232 = vmatpush.bf16.msrb.mxu1 %v3063_v57  ;;  %v3579_v57 = vor.u32 %v4427_v46, %v3578_v45  ;;  %v3567_v5 = vor.u32 %v4424_v62, %v3566_v61  ;;  %v4394_v11 = vld [vmem:[%s6923_s1 + $0x358] sm:$0xf0]  ;;  %v3542_v12 = vld [vmem:[%s6923_s1 + $0x410] sm:$0xf]  ;;  %v4391_v19 = vld [vmem:[%s6923_s1 + $0x340] sm:$0xf0] }
  0x76   :  { %1245 = vmatpush.bf16.msrb.mxu3 %v3159_v59  ;;  %1257 = vmatpush.bf16.msra.mxu0 %v3267_v0  ;;  %v3470_v59 = vld [vmem:[%s6923_s1 + $0x380] sm:$0xf]  ;;  %v3315_v0 = vor.u32 %v4361_v53, %v3314_v51  ;;  %v3447_v16 = vor.u32 %v4394_v11, %v3446_v10  ;;  %v1336_v18 = vld [vmem:[%s6925_s3 + $0x70] sm:$0xff]  ;;  %v4415_v20 = vld [vmem:[%s6923_s1 + $0x400] sm:$0xf0]  ;;  %s4679_s27 = smov 2  }
  0x77   :  { %v3471_v4 = vor.u32 %v4400_v60, %v3470_v59  ;;  %v3422_v24 = vld [vmem:[%s6923_s1 + $0x320] sm:$0xf]  ;;  %v4388_v25 = vld [vmem:[%s6923_s1 + $0x328] sm:$0xf0]  ;;  %v1333_v29 = vld [vmem:[%s6925_s3 + $0x58] sm:$0xff]  ;;  %vm2985_vm1 = vcmask 15360  }
  0x78   :  { %1270 = vmatpush.bf16.msra.mxu2 %v3363_v3  ;;  %v1337_v3 = vld [vmem:[%s6925_s3 + $0x78] sm:$0xff]  ;;  %v3518_v26 = vld [vmem:[%s6923_s1 + $0x3e0] sm:$0xf]  ;;  %v4412_v27 = vld [vmem:[%s6923_s1 + $0x3e8] sm:$0xf0]  ;;  %v3423_v30 = vor.u32 %v4388_v25, %v3422_v24 }
  0x79   :  { %1233 = vmatpush.bf16.msrb.mxu1 %v3051_v7  ;;  %v4421_v7 = vld [vmem:[%s6923_s1 + $0x430] sm:$0xf0]  ;;  %v1334_v28 = vld [vmem:[%s6925_s3 + $0x60] sm:$0xff]  ;;  %v3410_v33 = vld [vmem:[%s6923_s1 + $0x308] sm:$0xf] }
  0x7a   :  { %1246 = vmatpush.bf16.msrb.mxu3 %v3147_v8  ;;  %1258 = vmatpush.bf16.msra.mxu0 %v3255_v15  ;;  %v4418_v15 = vld [vmem:[%s6923_s1 + $0x418] sm:$0xf0]  ;;  %v4385_v36 = vld [vmem:[%s6923_s1 + $0x310] sm:$0xf0]  ;;  %v3506_v37 = vld [vmem:[%s6923_s1 + $0x3c8] sm:$0xf] }
  0x7b   :  { %v4409_v38 = vld [vmem:[%s6923_s1 + $0x3d0] sm:$0xf0]  ;;  %v1329_v43 = vld [vmem:[%s6925_s3 + $0x38] sm:$0xff]  ;;  %v1326_v46 = vld [vmem:[%s6925_s3 + $0x20] sm:$0xff] }
  0x7c   :  { %1271 = vmatpush.bf16.msra.mxu2 %v3351_v17  ;;  %v3543_v17 = vor.u32 %v4418_v15, %v3542_v12  ;;  %v1328_v44 = vld [vmem:[%s6925_s3 + $0x30] sm:$0xff]  ;;  %v5735_v48 = vld [vmem:[%s6924_s2] sm:$0x7]  ;;  %v1353_v55 = vld [vmem:[%s6925_s3 + $0xf8] sm:$0xff] }
  0x7d   :  { %1234 = vmatpush.bf16.msrb.mxu1 %v3039_v21  ;;  %v1335_v21 = vld [vmem:[%s6925_s3 + $0x68] sm:$0xff]  ;;  %v252_v51 = vperm.slane %v5735_v48, 0  ;;  %v1322_v53 = vld [vmem:[%s6925_s3] sm:$0xff]  ;;  %v1341_v24 = vld [vmem:[%s6925_s3 + $0x98] sm:$0xff] }
  0x7e   :  { %1247 = vmatpush.bf16.msrb.mxu3 %v3135_v22  ;;  %1259 = vmatpush.bf16.msra.mxu0 %v3243_v32  ;;  %v3519_v32 = vor.u32 %v4412_v27, %v3518_v26  ;;  %v1351_v60 = vld [vmem:[%s6925_s3 + $0xe8] sm:$0xff]  ;;  %v1346_v15 = vld [vmem:[%s6925_s3 + $0xc0] sm:$0xff]  ;;  %v1340_v25 = vld [vmem:[%s6925_s3 + $0x90] sm:$0xff]  ;;  %v253_v27 = vperm.slane %v5735_v48, 1 }
  0x7f   :  { %v1339_v26 = vld [vmem:[%s6925_s3 + $0x88] sm:$0xff] }
  0x80   :  { %1272 = vmatpush.bf16.msra.mxu2 %v3339_v35  ;;  %v1332_v35 = vld [vmem:[%s6925_s3 + $0x50] sm:$0xff] }
  0x81   :  { %1235 = vmatpush.bf16.msrb.mxu1 %v3027_v39  ;;  %v1331_v39 = vld [vmem:[%s6925_s3 + $0x48] sm:$0xff] }
  0x82   :  { %1248 = vmatpush.bf16.msrb.mxu3 %v3123_v40  ;;  %1260 = vmatpush.bf16.msra.mxu0 %v3231_v47  ;;  %v3411_v40 = vor.u32 %v4385_v36, %v3410_v33  ;;  %v1324_v47 = vld [vmem:[%s6925_s3 + $0x10] sm:$0xff] }
  0x84   :  { %1273 = vmatpush.bf16.msra.mxu2 %v3327_v49  ;;  %1236 = vmatmul.bf16.vlgmr.msrb.gmra.mxu1 %v5015_v1  ;;  %v3554_v1 = vld [vmem:[%s6923_s1 + $0x428] sm:$0xf] }
  0x85   :  { %1280 = vmatpush.bf16.msra.mxu1 %v3495_v41  ;;  %1249 = vmatmul.bf16.vlgmr.msrb.gmra.mxu3 %v5042_v13  ;;  %v4397_v13 = vld [vmem:[%s6923_s1 + $0x370] sm:$0xf0]  ;;  %v3555_v9 = vor.u32 %v4421_v7, %v3554_v1  ;;  %v3507_v41 = vor.u32 %v4409_v38, %v3506_v37  ;;  %v1323_v49 = vld [vmem:[%s6925_s3 + $0x8] sm:$0xff] }
  0x86   :  { %1293 = vmatpush.bf16.msra.mxu3 %v3591_v42  ;;  %1261 = vmatpush.bf16.msra.mxu0 %v3219_v63  ;;  %v3459_v8 = vor.u32 %v4397_v13, %v3458_v6  ;;  %v1330_v42 = vld [vmem:[%s6925_s3 + $0x40] sm:$0xff]  ;;  %v1349_v6 = vld [vmem:[%s6925_s3 + $0xd8] sm:$0xff]  ;;  %v1348_v1 = vld [vmem:[%s6925_s3 + $0xd0] sm:$0xff] }
  0x88   :  { %1274 = vmatpush.bf16.msra.mxu2 %v3315_v0 }
  0x89   :  { %1281 = vmatpush.bf16.msra.mxu1 %v3483_v56  ;;  %1262 = vmatmul.bf16.vlgmr.msra.gmra.mxu0 %v4998_v58  ;;  %v3434_v58 = vld [vmem:[%s6923_s1 + $0x338] sm:$0xf]  ;;  %v1352_v56 = vld [vmem:[%s6925_s3 + $0xf0] sm:$0xff] }
  0x8a   :  { %1294 = vmatpush.bf16.msra.mxu3 %v3579_v57  ;;  %1313 = vmatpush.bf16.msrb.mxu0 %v3603_v2  ;;  %v3435_v22 = vor.u32 %v4391_v19, %v3434_v58 }
  0x8b   :  { %1275 = vmatmul.bf16.vlgmr.msra.gmra.mxu2 %v5044_v14  ;;  %v3530_v14 = vld [vmem:[%s6923_s1 + $0x3f8] sm:$0xf]  ;;  %s4680_s1 = smov 126  }
  0x8c   :  { %1374 = vmatpush.msrb.mxu2 %v1337_v3  ;;  %v3531_v23 = vor.u32 %v4415_v20, %v3530_v14  ;;  %v1343_v14 = vld [vmem:[%s6925_s3 + $0xa8] sm:$0xff] }
  0x8d   :  { %1282 = vmatpush.bf16.msra.mxu1 %v3471_v4 }
  0x8e   :  { %1295 = vmatpush.bf16.msra.mxu3 %v3567_v5  ;;  %1375 = vmatpush.msrb.mxu2 %v1336_v18  ;;  %v1350_v5 = vld [vmem:[%s6925_s3 + $0xe0] sm:$0xff]  ;;  %v1344_v18 = vld [vmem:[%s6925_s3 + $0xb0] sm:$0xff] }
  0x8f   :  { %1394 = vmatpush.msra.mxu0 %v1353_v55 }
  0x90   :  { %1376 = vmatpush.msrb.mxu2 %v1335_v21 }
  0x91   :  { %1283 = vmatpush.bf16.msra.mxu1 %v3459_v8  ;;  %1395 = vmatpush.msra.mxu0 %v1352_v56  ;;  %v1362_v56 = vld [vmem:[%s6925_s3 + $0x140] sm:$0xff] }
  0x92   :  { %1296 = vmatpush.bf16.msra.mxu3 %v3555_v9  ;;  %1377 = vmatpush.msrb.mxu2 %v1334_v28  ;;  %v1347_v9 = vld [vmem:[%s6925_s3 + $0xc8] sm:$0xff]  ;;  %v1338_v28 = vld [vmem:[%s6925_s3 + $0x80] sm:$0xff] }
  0x93   :  { %1396 = vmatpush.msra.mxu0 %v1351_v60 }
  0x94   :  { %1378 = vmatpush.msrb.mxu2 %v1333_v29 }
  0x95   :  { %1284 = vmatpush.bf16.msra.mxu1 %v3447_v16  ;;  %1397 = vmatpush.msra.mxu0 %v1350_v5  ;;  %v1345_v16 = vld [vmem:[%s6925_s3 + $0xb8] sm:$0xff]  ;;  %v1355_v5 = vld [vmem:[%s6925_s3 + $0x108] sm:$0xff] }
  0x96   :  { %1297 = vmatpush.bf16.msra.mxu3 %v3543_v17  ;;  %1379 = vmatpush.msrb.mxu2 %v1332_v35 }
  0x97   :  { %1398 = vmatpush.msra.mxu0 %v1349_v6  ;;  %v1354_v6 = vld [vmem:[%s6925_s3 + $0x100] sm:$0xff] }
  0x98   :  { %1380 = vmatpush.msrb.mxu2 %v1331_v39  ;;  %v1369_v39 = vld [vmem:[%s6925_s3 + $0x178] sm:$0xff] }
  0x99   :  { %1285 = vmatpush.bf16.msra.mxu1 %v3435_v22  ;;  %3606 = vmatmul.msk.bf16.vlgmr.msrb.gmra.mxu0 %vm1042_vm0, %v5124_v52  ;;  %v1327_v52 = vld [vmem:[%s6925_s3 + $0x28] sm:$0xff]  ;;  %v1342_v22 = vld [vmem:[%s6925_s3 + $0xa0] sm:$0xff] }
  0x9a   :  { %1298 = vmatpush.bf16.msra.mxu3 %v3531_v23  ;;  %1381 = vmatpush.msrb.mxu2 %v1330_v42 }
  0x9b   :  { %1399 = vmatpush.msra.mxu0 %v1348_v1 }
  0x9c   :  { %1382 = vmatpush.msrb.mxu2 %v1329_v43 }
  0x9d   :  { %1286 = vmatpush.bf16.msra.mxu1 %v3423_v30  ;;  %1400 = vmatpush.msra.mxu0 %v1347_v9  ;;  %v254_v9 = vperm.slane %v5735_v48, 2  ;;  %v4610_v48 = vld [vmem:[%s6926_s4] ss:$0 sm:$0xff] }
  0x9e   :  { %1299 = vmatpush.bf16.msra.mxu3 %v3519_v32  ;;  %1383 = vmatpush.msrb.mxu2 %v1328_v44  ;;  %v1367_v44 = vld [vmem:[%s6925_s3 + $0x168] sm:$0xff] }
  0x9f   :  { %1401 = vmatpush.msra.mxu0 %v1346_v15 }
  0xa0   :  { %1384 = vmatpush.msrb.mxu2 %v1327_v52  ;;  %v1055_v45 = vpop.f32.mrf.mxu0  ;;  %v1366_v52 = vld [vmem:[%s6925_s3 + $0x160] sm:$0xff] }
  0xa1   :  { %1287 = vmatpush.bf16.msra.mxu1 %v3411_v40  ;;  %v1056_v61 = vadd.f32 %v1055_v45, %v252_v51  ;;  %1402 = vmatpush.msra.mxu0 %v1345_v16  ;;  %v1368_v40 = vld [vmem:[%s6925_s3 + $0x170] sm:$0xff]  ;;  %v1363_v51 = vld [vmem:[%s6925_s3 + $0x148] sm:$0xff] }
  0xa2   :  { %1300 = vmatpush.bf16.msra.mxu3 %v3507_v41  ;;  %1385 = vmatpush.msrb.mxu2 %v1326_v46  ;;  %v1365_v46 = vld [vmem:[%s6925_s3 + $0x158] sm:$0xff] }
  0xa3   :  { %1403 = vmatpush.msra.mxu0 %v1344_v18 }
  0xa4   :  { %1288 = vmatmul.bf16.vlgmr.msra.gmra.mxu1 %v5206_v31  ;;  %v1325_v31 = vld [vmem:[%s6925_s3 + $0x18] sm:$0xff] }
  0xa5   :  { %1301 = vmatmul.bf16.vlgmr.msra.gmra.mxu3 %v5214_v34  ;;  %v1068_v34 = vpop.f32.mrf.mxu1  ;;  %1386 = vmatpush.msrb.mxu2 %v1325_v31 }
  0xa6   :  { %v1069_v63 = vadd.f32 %v1068_v34, %v1056_v61  ;;  %1404 = vmatpush.msra.mxu0 %v1343_v14  ;;  %1414 = vmatpush.msrb.mxu1 %v1369_v39  ;;  %v1359_v61 = vld [vmem:[%s6925_s3 + $0x128] sm:$0xff]  ;;  %v4681_v39 = vmov 0  }
  0xa7   :  { %1387 = vmatpush.msrb.mxu2 %v1324_v47  ;;  %4607 = vset.pattern.permute.xlu1 %v4681_v39  ;;  %v3890_v39 = vld [vmem:[%s6930_s8 + $0x230] sm:$0xf] }
  0xa8   :  { %v1094_v54 = vpop.f32.mrf.mxu3  ;;  %v1057_v57 = vpop.f32.mrf.mxu0  ;;  %1405 = vmatpush.msra.mxu0 %v1342_v22  ;;  %1415 = vmatpush.msrb.mxu1 %v1368_v40  ;;  %v4682_v40 = vmov 1  }
  0xa9   :  { %1388 = vmatpush.msrb.mxu2 %v1323_v49  ;;  %v1364_v49 = vld [vmem:[%s6925_s3 + $0x150] sm:$0xff]  ;;  %v1361_v57 = vld [vmem:[%s6925_s3 + $0x138] sm:$0xff]  ;;  %4609 = vset.pattern.permute.xlu0 %v4682_v40 }
  0xaa   :  { %v1081_v50 = vpop.f32.mrf.mxu2  ;;  %1406 = vmatpush.msra.mxu0 %v1341_v24  ;;  %1416 = vmatpush.msrb.mxu1 %v1367_v44 }
  0xab   :  { %1389 = vmatpush.msrb.mxu2 %v1322_v53  ;;  %v1082_v2 = vadd.f32 %v1081_v50, %v1069_v63 }
  0xac   :  { %1407 = vmatpush.msra.mxu0 %v1340_v25  ;;  %1417 = vmatpush.msrb.mxu1 %v1366_v52  ;;  %v4542_v52 = vld [vmem:[%s6930_s8 + $0x360] sm:$0xf0] }
  0xad   :  { %v1070_v59 = vpop.f32.mrf.mxu1  ;;  %v1095_v4 = vadd.f32 %v1094_v54, %v1082_v2  ;;  %v1357_v2 = vld [vmem:[%s6925_s3 + $0x118] sm:$0xff] }
  0xae   :  { %1408 = vmatpush.msra.mxu0 %v1339_v26  ;;  %1418 = vmatpush.msrb.mxu1 %v1365_v46  ;;  %v1360_v59 = vld [vmem:[%s6925_s3 + $0x130] sm:$0xff]  ;;  %v4598_v46 = vld [vmem:[%s6930_s8 + $0x520] sm:$0xf0] }
  0xb0   :  { %v1096_v0 = vpop.f32.mrf.mxu3  ;;  %1409 = vmatpush.msra.mxu0 %v1338_v28  ;;  %1419 = vmatpush.msrb.mxu1 %v1364_v49  ;;  %v3808_v49 = vld [vmem:[%s6930_s8 + $0x1a4] sm:$0xf0] }
  0xb2   :  { %v1083_v62 = vpop.f32.mrf.mxu2  ;;  %1420 = vmatpush.msrb.mxu1 %v1363_v51 }
  0xb3   :  { %v1358_v62 = vld [vmem:[%s6925_s3 + $0x120] sm:$0xff] }
  0xb4   :  { %1421 = vmatpush.msrb.mxu1 %v1362_v56 }
  0xb6   :  { %1422 = vmatpush.msrb.mxu1 %v1361_v57 }
  0xb8   :  { %1423 = vmatpush.msrb.mxu1 %v1360_v59  ;;  %v4226_v59 = vld [vmem:[%s6930_s8 + $0x4d0] sm:$0xf] }
  0xba   :  { %v1133_v3 = vpop.f32.mrf.mxu2  ;;  %1424 = vmatpush.msrb.mxu1 %v1359_v61  ;;  %v4476_v61 = vld [vmem:[%s6930_s8 + $0x154] sm:$0xf] }
  0xbc   :  { %1425 = vmatpush.msrb.mxu1 %v1358_v62 }
  0xbe   :  { %1426 = vmatpush.msrb.mxu1 %v1357_v2  ;;  %v4472_v2 = vld [vmem:[%s6930_s8 + $0x130] sm:$0xf0] }
  0xc0   :  { %v1107_v13 = vpop.f32.mrf.mxu0 }
  0xc1   :  { %v1108_v7 = vadd.f32 %v1107_v13, %v1095_v4  ;;  %v1356_v4 = vld [vmem:[%s6925_s3 + $0x110] sm:$0xff] }
  0xc2   :  { %v1135_v11 = vpop.f32.mrf.mxu2  ;;  %1427 = vmatpush.msrb.mxu1 %v1356_v4  ;;  %v3974_v4 = vld [vmem:[%s6930_s8 + $0x2d8] sm:$0xf] }
  0xc3   :  { %v1120_v8 = vpop.f32.mrf.mxu1 }
  0xc4   :  { %v1121_v10 = vadd.f32 %v1120_v8, %v1108_v7  ;;  %1428 = vmatpush.msrb.mxu1 %v1355_v5  ;;  %v1437_v8 = vld [vmem:[%s6927_s5] sm:$0xff]  ;;  %v4528_v5 = vld [vmem:[%s6930_s8 + $0x2f0] sm:$0xf0] }
  0xc5   :  { %1439 = vrot.lane.b32.xlu0 %v1437_v8, %s4679_s27  ;;  %v3752_v8 = vld [vmem:[%s6930_s8 + $0x134] sm:$0xf0] }
  0xc6   :  { %v1134_v12 = vadd.f32 %v1133_v3, %v1121_v10  ;;  %1429 = vmatpush.msrb.mxu1 %v1354_v6  ;;  %v4198_v6 = vld [vmem:[%s6930_s8 + $0x498] sm:$0xf] }
  0xc8   :  { %4611 = vtanh.f32 %v1134_v12  ;;  %v1146_v17 = vpop.f32.mrf.mxu3  ;;  %v1109_v58 = vpop.f32.mrf.mxu0 }
  0xc9   :  { %v1147_v30 = vadd.f32 %v1146_v17, %v253_v27 }
  0xcb   :  { %v1122_v19 = vpop.f32.mrf.mxu1 }
  0xce   :  { %v4612_v20 = vpop.eup %4611  ;;  %v1159_v21 = vpop.f32.mrf.mxu2 }
  0xcf   :  { %1390 = vmatmul.f32.vlgmr.msrb.gmra.mxu2 %v4612_v20  ;;  %v1160_v32 = vadd.f32 %v1159_v21, %v1147_v30 }
  0xd0   :  { %v1148_v23 = vpop.f32.mrf.mxu3 }
  0xd6   :  { %v1161_v29 = vpop.f32.mrf.mxu2 }
  0xe0   :  { %v1172_v33 = vpop.f32.mrf.mxu0 }
  0xe1   :  { %v1185_v35 = vpop.f32.mrf.mxu1  ;;  %v1173_v36 = vadd.f32 %v1172_v33, %v1160_v32 }
  0xe3   :  { %v1186_v37 = vadd.f32 %v1185_v35, %v1173_v36 }
  0xe8   :  { %v1198_v38 = vpop.f32.mrf.mxu3  ;;  %v1174_v41 = vpop.f32.mrf.mxu0 }
  0xe9   :  { %v1187_v42 = vpop.f32.mrf.mxu1  ;;  %v1199_v43 = vadd.f32 %v1198_v38, %v1186_v37  ;;  %v3806_v41 = vld [vmem:[%s6930_s8 + $0x188] sm:$0xf] }
  0xea   :  { %v4486_v42 = vld [vmem:[%s6930_s8 + $0x1a0] sm:$0xf0] }
  0xeb   :  { %v3807_v44 = vor.u32 %v4486_v42, %v3806_v41  ;;  %v4507_v42 = vld [vmem:[%s6930_s8 + $0x248] sm:$0xf0] }
  0xed   :  { %2572 = vmatpush.bf16.msrb.mxu3 %v3807_v44  ;;  %v4563_v44 = vld [vmem:[%s6930_s8 + $0x408] sm:$0xf0] }
  0xee   :  { %v1211_v45 = vpop.f32.mrf.mxu2 }
  0xef   :  { %v1212_v31 = vadd.f32 %v1211_v45, %v1199_v43  ;;  %v4030_v43 = vld [vmem:[%s6930_s8 + $0x348] sm:$0xf] }
  0xf0   :  { %v1200_v34 = vpop.f32.mrf.mxu3  ;;  %v1224_v47 = vpop.f32.mrf.mxu0  ;;  %v4254_v45 = vld [vmem:[%s6930_s8 + $0x508] sm:$0xf] }
  0xf1   :  { %v1225_v50 = vadd.f32 %v1224_v47, %v1212_v31  ;;  %v4031_v31 = vor.u32 %v4542_v52, %v4030_v43  ;;  %v4255_v34 = vor.u32 %v4598_v46, %v4254_v45  ;;  %v4483_v47 = vld [vmem:[%s6930_s8 + $0x18c] sm:$0xf]  ;;  %v4114_v43 = vld [vmem:[%s6930_s8 + $0x3f0] sm:$0xf]  ;;  %v4448_v52 = vld [vmem:[%s6930_s8 + $0x74] sm:$0xf] }
  0xf2   :  { %v3811_v51 = vor.u32 %v4483_v47, %v3808_v49  ;;  %v3668_v45 = vld [vmem:[%s6930_s8 + $0x8c] sm:$0xf0]  ;;  %v4115_v47 = vor.u32 %v4563_v44, %v4114_v43  ;;  %v3638_v49 = vld [vmem:[%s6930_s8 + $0x38] sm:$0xf]  ;;  %v4473_v43 = vld [vmem:[%s6930_s8 + $0x138] sm:$0xf0] }
  0xf3   :  { %4613 = vtanh.f32 %v1225_v50  ;;  %v3778_v50 = vld [vmem:[%s6930_s8 + $0x150] sm:$0xf]  ;;  %2585 = vmatpush.bf16.msra.mxu2 %v4031_v31  ;;  %2598 = vmatpush.bf16.msrb.mxu0 %v4255_v34  ;;  %v3891_v34 = vor.u32 %v4507_v42, %v3890_v39  ;;  %v3758_v42 = vld [vmem:[%s6930_s8 + $0x120] sm:$0xf] }
  0xf4   :  { %2611 = vmatpush.bf16.msra.mxu1 %v3811_v51  ;;  %v3862_v51 = vld [vmem:[%s6930_s8 + $0x1f8] sm:$0xf] }
  0xf6   :  { %v1213_v53 = vpop.f32.mrf.mxu2 }
  0xf7   :  { %v4479_v53 = vld [vmem:[%s6930_s8 + $0x168] sm:$0xf0] }
  0xf8   :  { %v1226_v54 = vpop.f32.mrf.mxu0  ;;  %v3779_v56 = vor.u32 %v4479_v53, %v3778_v50  ;;  %v4444_v50 = vld [vmem:[%s6930_s8 + $0x50] sm:$0xf0] }
  0xf9   :  { %v4614_v55 = vpop.eup %4613  ;;  %v4002_v54 = vld [vmem:[%s6930_s8 + $0x310] sm:$0xf] }
  0xfa   :  { %1410 = vmatmul.f32.vlgmr.msra.gmra.mxu0 %v4614_v55  ;;  %v4535_v55 = vld [vmem:[%s6930_s8 + $0x328] sm:$0xf0]  ;;  %2573 = vmatpush.bf16.msrb.mxu3 %v3779_v56  ;;  %v4086_v56 = vld [vmem:[%s6930_s8 + $0x3b8] sm:$0xf] }
  0xfb   :  { %v4003_v57 = vor.u32 %v4535_v55, %v4002_v54  ;;  %v3671_v54 = vor.u32 %v4448_v52, %v3668_v45  ;;  %v4500_v55 = vld [vmem:[%s6930_s8 + $0x210] sm:$0xf0]  ;;  %v3759_v52 = vor.u32 %v4473_v43, %v3758_v42  ;;  %v3982_v45 = vld [vmem:[%s6930_s8 + $0x2e0] sm:$0xf]  ;;  %v3842_v42 = vld [vmem:[%s6930_s8 + $0x1c8] sm:$0xf] }
  0xfc   :  { %v4494_v43 = vld [vmem:[%s6930_s8 + $0x1e0] sm:$0xf0] }
  0xfd   :  { %2586 = vmatpush.bf16.msra.mxu2 %v4003_v57  ;;  %v4556_v57 = vld [vmem:[%s6930_s8 + $0x3d0] sm:$0xf0] }
 0x101   :  { %v1237_v60 = vpop.f32.mrf.mxu1 }
 0x102   :  { %v1238_v10 = vadd.f32 %v1237_v60, %v254_v9  ;;  %v4591_v60 = vld [vmem:[%s6930_s8 + $0x4e8] sm:$0xf0]  ;;  %v3975_v9 = vor.u32 %v4528_v5, %v3974_v4  ;;  %v4058_v5 = vld [vmem:[%s6930_s8 + $0x380] sm:$0xf] }
 0x103   :  { %v4227_v62 = vor.u32 %v4591_v60, %v4226_v59  ;;  %v4441_v59 = vld [vmem:[%s6930_s8 + $0x3c] sm:$0xf]  ;;  %v3639_v60 = vor.u32 %v4444_v50, %v3638_v49  ;;  %v4574_v49 = vld [vmem:[%s6930_s8 + $0x464] sm:$0xf]  ;;  %v4172_v50 = vld [vmem:[%s6930_s8 + $0x47c] sm:$0xf0] }
 0x104   :  { %2587 = vmatpush.bf16.msra.mxu2 %v3975_v9 }
 0x105   :  { %2599 = vmatpush.bf16.msrb.mxu0 %v4227_v62  ;;  %v3863_v62 = vor.u32 %v4500_v55, %v3862_v51  ;;  %v4466_v55 = vld [vmem:[%s6930_s8 + $0x100] sm:$0xf0] }
 0x106   :  { %v1263_v0 = vpop.f32.mrf.mxu0 }
 0x108   :  { %v1250_v63 = vpop.f32.mrf.mxu3 }
 0x109   :  { %v1239_v3 = vpop.f32.mrf.mxu1  ;;  %v1251_v15 = vadd.f32 %v1250_v63, %v1238_v10  ;;  %v3780_v63 = vld [vmem:[%s6930_s8 + $0x16c] sm:$0xf0] }
 0x10a   :  { %v3783_v3 = vor.u32 %v4476_v61, %v3780_v63  ;;  %v3610_v61 = vld [vmem:[%s6930_s8] sm:$0xf]  ;;  %v4087_v63 = vor.u32 %v4556_v57, %v4086_v56  ;;  %v3954_v56 = vld [vmem:[%s6930_s8 + $0x2a8] sm:$0xf] }
 0x10b   :  { %v1264_v16 = vadd.f32 %v1263_v0, %v1251_v15  ;;  %v3750_v0 = vld [vmem:[%s6930_s8 + $0x118] sm:$0xf]  ;;  %v3946_v15 = vld [vmem:[%s6930_s8 + $0x2a0] sm:$0xf] }
 0x10c   :  { %2612 = vmatpush.bf16.msra.mxu1 %v3783_v3  ;;  %v4493_v3 = vld [vmem:[%s6930_s8 + $0x1d8] sm:$0xf0] }
 0x10e   :  { %v1276_v13 = vpop.f32.mrf.mxu2  ;;  %v1265_v7 = vpop.f32.mrf.mxu0 }
 0x10f   :  { %v1277_v18 = vadd.f32 %v1276_v13, %v1264_v16  ;;  %v3751_v13 = vor.u32 %v4472_v2, %v3750_v0  ;;  %v4469_v7 = vld [vmem:[%s6930_s8 + $0x11c] sm:$0xf]  ;;  %v3834_v2 = vld [vmem:[%s6930_s8 + $0x1c0] sm:$0xf] }
 0x110   :  { %v1252_v1 = vpop.f32.mrf.mxu3  ;;  %v3755_v16 = vor.u32 %v4469_v7, %v3752_v8  ;;  %v4437_v0 = vld [vmem:[%s6930_s8 + $0x18] sm:$0xf0]  ;;  %v4539_v7 = vld [vmem:[%s6930_s8 + $0x34c] sm:$0xf]  ;;  %v4032_v8 = vld [vmem:[%s6930_s8 + $0x364] sm:$0xf0] }
 0x111   :  { %v4584_v1 = vld [vmem:[%s6930_s8 + $0x4b0] sm:$0xf0]  ;;  %2574 = vmatpush.bf16.msrb.mxu3 %v3751_v13  ;;  %v4434_v13 = vld [vmem:[%s6930_s8 + $0x4] sm:$0xf]  ;;  %v3611_v9 = vor.u32 %v4437_v0, %v3610_v61  ;;  %v3920_v61 = vld [vmem:[%s6930_s8 + $0x284] sm:$0xf0] }
 0x112   :  { %v4199_v10 = vor.u32 %v4584_v1, %v4198_v6  ;;  %2613 = vmatpush.bf16.msra.mxu1 %v3755_v16  ;;  %v4549_v6 = vld [vmem:[%s6930_s8 + $0x398] sm:$0xf0]  ;;  %v3612_v1 = vld [vmem:[%s6930_s8 + $0x1c] sm:$0xf0]  ;;  %v4487_v16 = vld [vmem:[%s6930_s8 + $0x1a8] sm:$0xf0] }
 0x113   :  { %v4144_v0 = vld [vmem:[%s6930_s8 + $0x444] sm:$0xf0] }
 0x114   :  { %2600 = vmatpush.bf16.msrb.mxu0 %v4199_v10  ;;  %v4595_v10 = vld [vmem:[%s6930_s8 + $0x50c] sm:$0xf] }
 0x116   :  { %v1278_v11 = vpop.f32.mrf.mxu2  ;;  %v1315_v12 = vpop.f32.mrf.mxu0 }
 0x117   :  { %v3722_v11 = vld [vmem:[%s6930_s8 + $0xe0] sm:$0xf] }
 0x11e   :  { %v1317_v58 = vpop.f32.mrf.mxu0 }
 0x11f   :  { %v4170_v58 = vld [vmem:[%s6930_s8 + $0x460] sm:$0xf] }
 0x121   :  { %v1289_v17 = vpop.f32.mrf.mxu1 }
 0x122   :  { %v1290_v19 = vadd.f32 %v1289_v17, %v1277_v18  ;;  %v4521_v17 = vld [vmem:[%s6930_s8 + $0x2b8] sm:$0xf0] }
 0x123   :  { %v4577_v18 = vld [vmem:[%s6930_s8 + $0x478] sm:$0xf0] }
 0x128   :  { %v1302_v14 = vpop.f32.mrf.mxu3 }
 0x129   :  { %v1303_v20 = vadd.f32 %v1302_v14, %v1290_v19  ;;  %v1291_v21 = vpop.f32.mrf.mxu1  ;;  %v4462_v19 = vld [vmem:[%s6930_s8 + $0xe4] sm:$0xf]  ;;  %v3724_v14 = vld [vmem:[%s6930_s8 + $0xfc] sm:$0xf0] }
 0x12a   :  { %v3947_v21 = vor.u32 %v4521_v17, %v3946_v15  ;;  %v3835_v15 = vor.u32 %v4493_v3, %v3834_v2  ;;  %v4038_v17 = vld [vmem:[%s6930_s8 + $0x350] sm:$0xf]  ;;  %v4459_v3 = vld [vmem:[%s6930_s8 + $0xc8] sm:$0xf0] }
 0x12b   :  { %v1316_v22 = vadd.f32 %v1315_v12, %v1303_v20  ;;  %v4465_v12 = vld [vmem:[%s6930_s8 + $0xf8] sm:$0xf0]  ;;  %v3702_v2 = vld [vmem:[%s6930_s8 + $0xb0] sm:$0xf] }
 0x12c   :  { %v3723_v20 = vor.u32 %v4465_v12, %v3722_v11  ;;  %2588 = vmatpush.bf16.msra.mxu2 %v3947_v21  ;;  %v4256_v11 = vld [vmem:[%s6930_s8 + $0x524] sm:$0xf0]  ;;  %v3814_v12 = vld [vmem:[%s6930_s8 + $0x190] sm:$0xf]  ;;  %v4532_v21 = vld [vmem:[%s6930_s8 + $0x314] sm:$0xf] }
 0x12d   :  { %4615 = vtanh.f32 %v1316_v22  ;;  %v4171_v22 = vor.u32 %v4577_v18, %v4170_v58  ;;  %v4543_v58 = vld [vmem:[%s6930_s8 + $0x368] sm:$0xf0]  ;;  %v4059_v18 = vor.u32 %v4549_v6, %v4058_v5  ;;  %v3703_v5 = vor.u32 %v4459_v3, %v3702_v2  ;;  %v3926_v6 = vld [vmem:[%s6930_s8 + $0x270] sm:$0xf] }
 0x12e   :  { %2575 = vmatpush.bf16.msrb.mxu3 %v3723_v20  ;;  %v4259_v20 = vor.u32 %v4595_v10, %v4256_v11  ;;  %v4116_v11 = vld [vmem:[%s6930_s8 + $0x40c] sm:$0xf0] }
 0x12f   :  { %2601 = vmatpush.bf16.msrb.mxu0 %v4171_v22  ;;  %v4004_v22 = vld [vmem:[%s6930_s8 + $0x32c] sm:$0xf0] }
 0x130   :  { %v1304_v23 = vpop.f32.mrf.mxu3 }
 0x131   :  { %v3694_v23 = vld [vmem:[%s6930_s8 + $0xa8] sm:$0xf] }
 0x133   :  { %v4616_v24 = vpop.eup %4615 }
 0x134   :  { %1430 = vmatmul.f32.vlgmr.msrb.gmra.mxu1 %v4616_v24  ;;  %v4458_v24 = vld [vmem:[%s6930_s8 + $0xc0] sm:$0xf0] }
 0x137   :  { %v1440_v35 = vpop.permute.xlu0 %1439 }
 0x152   :  { %v1391_v25 = vpop.f32.mrf.mxu2 }
 0x153   :  { %v1392_v27 = vadd.f32 %v4610_v48, %v1391_v25  ;;  %v3918_v48 = vld [vmem:[%s6930_s8 + $0x268] sm:$0xf]  ;;  %v3727_v25 = vor.u32 %v4462_v19, %v3724_v14  ;;  %v3615_v19 = vor.u32 %v4434_v13, %v3612_v1  ;;  %v4035_v14 = vor.u32 %v4539_v7, %v4032_v8  ;;  %v4515_v13 = vld [vmem:[%s6930_s8 + $0x288] sm:$0xf0]  ;;  %v4504_v7 = vld [vmem:[%s6930_s8 + $0x234] sm:$0xf] }
 0x154   :  { %v3927_v1 = vor.u32 %v4515_v13, %v3926_v6  ;;  %v3892_v8 = vld [vmem:[%s6930_s8 + $0x24c] sm:$0xf0] }
 0x155   :  { %2614 = vmatpush.bf16.msra.mxu1 %v3727_v25  ;;  %v4228_v25 = vld [vmem:[%s6930_s8 + $0x4ec] sm:$0xf0]  ;;  %v3895_v10 = vor.u32 %v4504_v7, %v3892_v8  ;;  %v4484_v7 = vld [vmem:[%s6930_s8 + $0x194] sm:$0xf] }
 0x156   :  { %v4262_v13 = vld [vmem:[%s6930_s8 + $0x510] sm:$0xf] }
 0x157   :  { %v3816_v8 = vld [vmem:[%s6930_s8 + $0x1ac] sm:$0xf0] }
 0x177   :  { %v1411_v26 = vpop.f32.mrf.mxu0 }
 0x178   :  { %v1412_v28 = vadd.f32 %v1411_v26, %v1392_v27  ;;  %v4514_v26 = vld [vmem:[%s6930_s8 + $0x280] sm:$0xf0]  ;;  %v4142_v27 = vld [vmem:[%s6930_s8 + $0x428] sm:$0xf] }
 0x1b1   :  { %v1431_v29 = vpop.f32.mrf.mxu1 }
 0x1b2   :  { %v5848_v30 = vadd.f32 %v1431_v29, %v1412_v28  ;;  %v4570_v28 = vld [vmem:[%s6930_s8 + $0x440] sm:$0xf0]  ;;  %v4455_v29 = vld [vmem:[%s6930_s8 + $0xac] sm:$0xf] }
 0x1b4   :  { %2988 = vrot.lane.b32.xlu2 %v5848_v30, %s4680_s1  ;;  %v1434_v32 = vmul.f32 0.5, %v5848_v30  ;;  %2986 = vst.msk [vmem:[%s6933_s11] sm:$0xff] %vm2985_vm1, %v5848_v30 }
 0x1b6   :  { %v1435_v33 = vmul.f32 1.442695, %v1434_v32  ;;  %v3696_v32 = vld [vmem:[%s6930_s8 + $0xc4] sm:$0xf0] }
 0x1b7   :  { %v3699_v41 = vor.u32 %v4455_v29, %v3696_v32  ;;  %v4007_v29 = vor.u32 %v4532_v21, %v4004_v22  ;;  %v4553_v21 = vld [vmem:[%s6930_s8 + $0x3bc] sm:$0xf] }
 0x1b8   :  { %4617 = vpow2.f32 %v1435_v33  ;;  %v3695_v33 = vor.u32 %v4458_v24, %v3694_v23  ;;  %v3815_v23 = vor.u32 %v4487_v16, %v3814_v12  ;;  %v4039_v24 = vor.u32 %v4543_v58, %v4038_v17  ;;  %v3674_v12 = vld [vmem:[%s6930_s8 + $0x78] sm:$0xf] }
 0x1b9   :  { %2615 = vmatpush.bf16.msra.mxu1 %v3699_v41  ;;  %v4200_v41 = vld [vmem:[%s6930_s8 + $0x4b4] sm:$0xf0] }
 0x1ba   :  { %2576 = vmatpush.bf16.msrb.mxu3 %v3695_v33  ;;  %v3898_v58 = vld [vmem:[%s6930_s8 + $0x238] sm:$0xf] }
 0x1bd   :  { %2616 = vmatpush.bf16.msra.mxu1 %v3671_v54  ;;  %v3730_v54 = vld [vmem:[%s6930_s8 + $0xe8] sm:$0xf] }
 0x1be   :  { %v4618_v36 = vpop.eup %4617  ;;  %v3731_v57 = vor.u32 %v4466_v55, %v3730_v54 }
 0x1bf   :  { %v1442_v37 = vmul.f32 %v4618_v36, %v1440_v35  ;;  %v3919_v35 = vor.u32 %v4514_v26, %v3918_v48  ;;  %v4143_v36 = vor.u32 %v4570_v28, %v4142_v27  ;;  %v4588_v48 = vld [vmem:[%s6930_s8 + $0x4d4] sm:$0xf]  ;;  %v3786_v26 = vld [vmem:[%s6930_s8 + $0x158] sm:$0xf] }
 0x1c0   :  { %v4010_v27 = vld [vmem:[%s6930_s8 + $0x318] sm:$0xf]  ;;  %v4536_v28 = vld [vmem:[%s6930_s8 + $0x330] sm:$0xf0]  ;;  %v4231_v32 = vor.u32 %v4588_v48, %v4228_v25  ;;  %v4445_v48 = vld [vmem:[%s6930_s8 + $0x58] sm:$0xf0] }
 0x1c1   :  { %1444 = vrot.lane.b32.xlu0 %v1442_v37, %s4680_s1  ;;  %v3666_v37 = vld [vmem:[%s6930_s8 + $0x70] sm:$0xf]  ;;  %2589 = vmatpush.bf16.msra.mxu2 %v3919_v35  ;;  %v4011_v35 = vor.u32 %v4536_v28, %v4010_v27  ;;  %v4501_v27 = vld [vmem:[%s6930_s8 + $0x218] sm:$0xf0] }
 0x1c2   :  { %2602 = vmatpush.bf16.msrb.mxu0 %v4143_v36  ;;  %v4525_v36 = vld [vmem:[%s6930_s8 + $0x2dc] sm:$0xf] }
 0x1c5   :  { %2590 = vmatpush.bf16.msra.mxu2 %v3891_v34 }
 0x1c6   :  { %2603 = vmatpush.bf16.msrb.mxu0 %v4115_v47  ;;  %v3948_v47 = vld [vmem:[%s6930_s8 + $0x2bc] sm:$0xf0] }
 0x1c9   :  { %2591 = vmatpush.bf16.msra.mxu2 %v3863_v62  ;;  %v4567_v62 = vld [vmem:[%s6930_s8 + $0x42c] sm:$0xf] }
 0x1ca   :  { %2604 = vmatpush.bf16.msrb.mxu0 %v4087_v63 }
 0x1cd   :  { %2592 = vmatpush.bf16.msra.mxu2 %v3835_v15  ;;  %v4452_v15 = vld [vmem:[%s6930_s8 + $0x90] sm:$0xf0] }
 0x1ce   :  { %2605 = vmatpush.bf16.msrb.mxu0 %v4059_v18  ;;  %v3675_v17 = vor.u32 %v4452_v15, %v3674_v12  ;;  %v4508_v18 = vld [vmem:[%s6930_s8 + $0x250] sm:$0xf0]  ;;  %v4264_v12 = vld [vmem:[%s6930_s8 + $0x52c] sm:$0xf0] }
 0x1d1   :  { %2637 = vmatpush.bf16.msrb.mxu2 %v4259_v20  ;;  %v3864_v20 = vld [vmem:[%s6930_s8 + $0x214] sm:$0xf0] }
 0x1d2   :  { %2650 = vmatpush.bf16.msra.mxu0 %v3815_v23  ;;  %v4088_v23 = vld [vmem:[%s6930_s8 + $0x3d4] sm:$0xf0] }
 0x1d3   :  { %v4091_v25 = vor.u32 %v4553_v21, %v4088_v23 }
 0x1d5   :  { %2638 = vmatpush.bf16.msrb.mxu2 %v4231_v32  ;;  %v3836_v32 = vld [vmem:[%s6930_s8 + $0x1dc] sm:$0xf0] }
 0x20e   :  { %v2989_v38 = vpop.permute.xlu2 %2988 }
 0x20f   :  { %2991 = vst.msk [vmem:[%s6934_s12] sm:$0xff] %vm2985_vm1, %v2989_v38  ;;  %v4451_v38 = vld [vmem:[%s6930_s8 + $0x88] sm:$0xf0] }
 0x210   :  { %v3667_v46 = vor.u32 %v4451_v38, %v3666_v37  ;;  %v3976_v37 = vld [vmem:[%s6930_s8 + $0x2f4] sm:$0xf0]  ;;  %v4581_v38 = vld [vmem:[%s6930_s8 + $0x49c] sm:$0xf] }
 0x211   :  { %v3979_v39 = vor.u32 %v4525_v36, %v3976_v37  ;;  %v4203_v44 = vor.u32 %v4581_v38, %v4200_v41  ;;  %v4060_v36 = vld [vmem:[%s6930_s8 + $0x39c] sm:$0xf0]  ;;  %v3618_v37 = vld [vmem:[%s6930_s8 + $0x8] sm:$0xf]  ;;  %v4438_v38 = vld [vmem:[%s6930_s8 + $0x20] sm:$0xf0] }
 0x212   :  { %2577 = vmatpush.bf16.msrb.mxu3 %v3667_v46  ;;  %v4529_v46 = vld [vmem:[%s6930_s8 + $0x2f8] sm:$0xf0]  ;;  %v3619_v41 = vor.u32 %v4438_v38, %v3618_v37  ;;  %v4470_v38 = vld [vmem:[%s6930_s8 + $0x124] sm:$0xf] }
 0x213   :  { %v3983_v34 = vor.u32 %v4529_v46, %v3982_v45  ;;  %2639 = vmatpush.bf16.msrb.mxu2 %v4203_v44  ;;  %v3843_v44 = vor.u32 %v4494_v43, %v3842_v42  ;;  %v1448_v45 = vld [vmem:[%s6928_s6] ss:$2 sm:$0x7]  ;;  %v3607_v46 = vld [vmem:[%s6928_s6 + $0x1] ss:$2 sm:$0x7] }
 0x214   :  { %v3984_v42 = vld [vmem:[%s6930_s8 + $0x2fc] sm:$0xf0]  ;;  %v4582_v43 = vld [vmem:[%s6930_s8 + $0x4a4] sm:$0xf]  ;;  %s2999_s6 = sshll.u32 %s6932_s10, 4  ;;  %s3000_s6 = int_to_ptr.hbm [resolvable:$true] %s2999_s6 }
 0x216   :  { %2578 = vmatpush.bf16.msrb.mxu3 %v3639_v60  ;;  %v4511_v60 = vld [vmem:[%s6930_s8 + $0x26c] sm:$0xf] }
 0x217   :  { %v3923_v63 = vor.u32 %v4511_v60, %v3920_v61 }
 0x21a   :  { %2579 = vmatpush.bf16.msrb.mxu3 %v3611_v9  ;;  %v4560_v9 = vld [vmem:[%s6930_s8 + $0x3f4] sm:$0xf] }
 0x21b   :  { %v4119_v16 = vor.u32 %v4560_v9, %v4116_v11  ;;  %v4540_v9 = vld [vmem:[%s6930_s8 + $0x354] sm:$0xf] }
 0x21c   :  { %v4596_v11 = vld [vmem:[%s6930_s8 + $0x514] sm:$0xf] }
 0x21d   :  { %v4267_v23 = vor.u32 %v4596_v11, %v4264_v12  ;;  %v4505_v11 = vld [vmem:[%s6930_s8 + $0x23c] sm:$0xf]  ;;  %v3900_v12 = vld [vmem:[%s6930_s8 + $0x254] sm:$0xf0] }
 0x21e   :  { %2624 = vmatpush.bf16.msra.mxu3 %v4035_v14  ;;  %v4497_v14 = vld [vmem:[%s6930_s8 + $0x1fc] sm:$0xf] }
 0x21f   :  { %v3867_v22 = vor.u32 %v4497_v14, %v3864_v20  ;;  %v4592_v14 = vld [vmem:[%s6930_s8 + $0x4f0] sm:$0xf0] }
 0x222   :  { %2625 = vmatpush.bf16.msra.mxu3 %v4007_v29  ;;  %v4490_v29 = vld [vmem:[%s6930_s8 + $0x1c4] sm:$0xf] }
 0x226   :  { %2626 = vmatpush.bf16.msra.mxu3 %v3979_v39 }
 0x233   :  { %v1445_v31 = vpop.permute.xlu0 %1444 }
 0x234   :  { %v1447_v53 = vadd.f32 %v1445_v31, %v5848_v30  ;;  %v3640_v30 = vld [vmem:[%s6930_s8 + $0x54] sm:$0xf0]  ;;  %v4518_v31 = vld [vmem:[%s6930_s8 + $0x2a4] sm:$0xf] }
 0x235   :  { %v3643_v4 = vor.u32 %v4441_v59, %v3640_v30  ;;  %v3951_v51 = vor.u32 %v4518_v31, %v3948_v47  ;;  %v4522_v59 = vld [vmem:[%s6930_s8 + $0x2c0] sm:$0xf0]  ;;  %v1455_v31 = vperm.slane %v1448_v45, 0  ;;  %v1483_v47 = vld [vmem:[%s6929_s7] sm:$0x7] }
 0x236   :  { %1451 = vperm.xlu1 %4607, %v1447_v53   ;;  %v3955_v30 = vor.u32 %v4522_v59, %v3954_v56  ;;  %v1485_v54 = vperm.slane %v1483_v47, 0  ;;  %v1487_v59 = vperm.slane %v1483_v47, 2 }
 0x237   :  { %2617 = vmatpush.bf16.msra.mxu1 %v3643_v4  ;;  %2627 = vmatpush.bf16.msra.mxu3 %v3951_v51  ;;  %v4147_v4 = vor.u32 %v4567_v62, %v4144_v0  ;;  %v1472_v51 = vperm.slane %v3607_v46, 1 }
 0x23b   :  { %2618 = vmatpush.bf16.msra.mxu1 %v3615_v19  ;;  %2628 = vmatpush.bf16.msra.mxu3 %v3923_v63  ;;  %v3899_v19 = vor.u32 %v4508_v18, %v3898_v58  ;;  %v3819_v18 = vor.u32 %v4484_v7, %v3816_v8 }
 0x23e   :  { %4608 = vset.pattern.permute.xlu1 %v4682_v40  ;;  %v4480_v40 = vld [vmem:[%s6930_s8 + $0x170] sm:$0xf0] }
 0x23f   :  { %1467 = vperm.xlu1 %4608, %v1447_v53   ;;  %2663 = vmatpush.bf16.msrb.mxu1 %v4039_v24  ;;  %v3787_v33 = vor.u32 %v4480_v40, %v3786_v26  ;;  %v4175_v53 = vor.u32 %v4574_v49, %v4172_v50  ;;  %v3646_v24 = vld [vmem:[%s6930_s8 + $0x40] sm:$0xf]  ;;  %v1457_v49 = vperm.slane %v1448_v45, 2  ;;  %v1471_v50 = vperm.slane %v3607_v46, 0 }
 0x240   :  { %2629 = vmatpush.bf16.msra.mxu3 %v3895_v10  ;;  %v3647_v26 = vor.u32 %v4445_v48, %v3646_v24  ;;  %v3870_v40 = vld [vmem:[%s6930_s8 + $0x200] sm:$0xf]  ;;  %v4040_v10 = vld [vmem:[%s6930_s8 + $0x36c] sm:$0xf0]  ;;  %v4477_v24 = vld [vmem:[%s6930_s8 + $0x15c] sm:$0xf] }
 0x241   :  { %2651 = vmatpush.bf16.msra.mxu0 %v3787_v33  ;;  %2640 = vmatpush.bf16.msrb.mxu2 %v4175_v53  ;;  %v3871_v28 = vor.u32 %v4501_v27, %v3870_v40  ;;  %v4546_v33 = vld [vmem:[%s6930_s8 + $0x384] sm:$0xf]  ;;  %v1473_v53 = vperm.slane %v3607_v46, 2  ;;  %v3788_v48 = vld [vmem:[%s6930_s8 + $0x174] sm:$0xf0] }
 0x242   :  { %v4063_v39 = vor.u32 %v4546_v33, %v4060_v36  ;;  %v4012_v40 = vld [vmem:[%s6930_s8 + $0x334] sm:$0xf0]  ;;  %v4589_v27 = vld [vmem:[%s6930_s8 + $0x4dc] sm:$0xf]  ;;  %v4206_v33 = vld [vmem:[%s6930_s8 + $0x4a0] sm:$0xf] }
 0x243   :  { %2664 = vmatpush.bf16.msrb.mxu1 %v4011_v35  ;;  %v3839_v35 = vor.u32 %v4490_v29, %v3836_v32  ;;  %v3791_v32 = vor.u32 %v4477_v24, %v3788_v48  ;;  %v4178_v46 = vld [vmem:[%s6930_s8 + $0x468] sm:$0xf]  ;;  %v3648_v24 = vld [vmem:[%s6930_s8 + $0x5c] sm:$0xf0]  ;;  %v4498_v48 = vld [vmem:[%s6930_s8 + $0x204] sm:$0xf] }
 0x244   :  { %2630 = vmatpush.bf16.msra.mxu3 %v3867_v22  ;;  %v4043_v22 = vor.u32 %v4540_v9, %v4040_v10  ;;  %v4449_v9 = vld [vmem:[%s6930_s8 + $0x7c] sm:$0xf]  ;;  %v3676_v10 = vld [vmem:[%s6930_s8 + $0x94] sm:$0xf0] }
 0x245   :  { %2652 = vmatpush.bf16.msra.mxu0 %v3759_v52  ;;  %2641 = vmatpush.bf16.msrb.mxu2 %v4147_v4 }
 0x247   :  { %2665 = vmatpush.bf16.msrb.mxu1 %v3983_v34  ;;  %v1456_v34 = vperm.slane %v1448_v45, 1 }
 0x248   :  { %2631 = vmatpush.bf16.msra.mxu3 %v3839_v35  ;;  %v4585_v35 = vld [vmem:[%s6930_s8 + $0x4b8] sm:$0xf0] }
 0x249   :  { %2653 = vmatpush.bf16.msra.mxu0 %v3731_v57  ;;  %2642 = vmatpush.bf16.msrb.mxu2 %v4119_v16  ;;  %v1486_v57 = vperm.slane %v1483_v47, 1 }
 0x24b   :  { %2666 = vmatpush.bf16.msrb.mxu1 %v3955_v30 }
 0x24d   :  { %2654 = vmatpush.bf16.msra.mxu0 %v3703_v5  ;;  %2643 = vmatpush.bf16.msrb.mxu2 %v4091_v25  ;;  %v4533_v25 = vld [vmem:[%s6930_s8 + $0x31c] sm:$0xf] }
 0x24e   :  { %v4015_v36 = vor.u32 %v4533_v25, %v4012_v40  ;;  %v3872_v25 = vld [vmem:[%s6930_s8 + $0x21c] sm:$0xf0]  ;;  %v4554_v40 = vld [vmem:[%s6930_s8 + $0x3c4] sm:$0xf] }
 0x24f   :  { %2667 = vmatpush.bf16.msrb.mxu1 %v3927_v1  ;;  %v4599_v1 = vld [vmem:[%s6930_s8 + $0x528] sm:$0xf0] }
 0x250   :  { %v4263_v16 = vor.u32 %v4599_v1, %v4262_v13  ;;  %v4122_v13 = vld [vmem:[%s6930_s8 + $0x3f8] sm:$0xf]  ;;  %v4564_v1 = vld [vmem:[%s6930_s8 + $0x410] sm:$0xf0] }
 0x251   :  { %2655 = vmatpush.bf16.msra.mxu0 %v3675_v17  ;;  %2644 = vmatpush.bf16.msrb.mxu2 %v4063_v39  ;;  %v3760_v39 = vld [vmem:[%s6930_s8 + $0x13c] sm:$0xf0] }
 0x252   :  { %v3763_v45 = vor.u32 %v4470_v38, %v3760_v39  ;;  %v3875_v38 = vor.u32 %v4498_v48, %v3872_v25  ;;  %v4579_v48 = vld [vmem:[%s6930_s8 + $0x488] sm:$0xf0]  ;;  %v4464_v25 = vld [vmem:[%s6930_s8 + $0xf4] sm:$0xf] }
 0x253   :  { %2668 = vmatpush.bf16.msrb.mxu1 %v3899_v19  ;;  %v4234_v19 = vld [vmem:[%s6930_s8 + $0x4d8] sm:$0xf] }
 0x254   :  { %v4235_v29 = vor.u32 %v4592_v14, %v4234_v19  ;;  %v4094_v19 = vld [vmem:[%s6930_s8 + $0x3c0] sm:$0xf]  ;;  %v4557_v14 = vld [vmem:[%s6930_s8 + $0x3d8] sm:$0xf0] }
 0x255   :  { %2656 = vmatpush.bf16.msra.mxu0 %v3647_v26 }
 0x257   :  { %2669 = vmatpush.bf16.msrb.mxu1 %v3871_v28  ;;  %v4236_v28 = vld [vmem:[%s6930_s8 + $0x4f4] sm:$0xf0] }
 0x258   :  { %v4239_v37 = vor.u32 %v4589_v27, %v4236_v28  ;;  %v4096_v27 = vld [vmem:[%s6930_s8 + $0x3dc] sm:$0xf0]  ;;  %v4095_v28 = vor.u32 %v4557_v14, %v4094_v19  ;;  %v3738_v19 = vld [vmem:[%s6930_s8 + $0xf0] sm:$0xf]  ;;  %v4467_v14 = vld [vmem:[%s6930_s8 + $0x108] sm:$0xf0] }
 0x259   :  { %2657 = vmatpush.bf16.msra.mxu0 %v3619_v41  ;;  %v4526_v41 = vld [vmem:[%s6930_s8 + $0x2e4] sm:$0xf]  ;;  %v4099_v39 = vor.u32 %v4554_v40, %v4096_v27  ;;  %v3740_v40 = vld [vmem:[%s6930_s8 + $0x10c] sm:$0xf0]  ;;  %v3739_v27 = vor.u32 %v4467_v14, %v3738_v19  ;;  %v4272_v19 = vld [vmem:[%s6930_s8 + $0x534] sm:$0xf0] }
 0x25a   :  { %v3830_v14 = vld [vmem:[%s6930_s8 + $0x1a0] sm:$0xf] }
 0x25b   :  { %2670 = vmatpush.bf16.msrb.mxu1 %v3843_v44  ;;  %v4208_v44 = vld [vmem:[%s6930_s8 + $0x4bc] sm:$0xf0] }
 0x25c   :  { %v4211_v47 = vor.u32 %v4582_v43, %v4208_v44  ;;  %v4488_v43 = vld [vmem:[%s6930_s8 + $0x1b0] sm:$0xf0]  ;;  %v4547_v44 = vld [vmem:[%s6930_s8 + $0x38c] sm:$0xf] }
 0x2a8   :  { %v1452_v52 = vpop.permute.xlu1 %1451 }
 0x2a9   :  { %v1461_v55 = vmul.f32 %v1455_v31, %v1452_v52  ;;  %v1462_v56 = vmul.f32 %v1456_v34, %v1452_v52  ;;  %v1463_v60 = vmul.f32 %v1457_v49, %v1452_v52  ;;  %v4207_v52 = vor.u32 %v4585_v35, %v4206_v33  ;;  %v4578_v31 = vld [vmem:[%s6930_s8 + $0x480] sm:$0xf0]  ;;  %v4463_v49 = vld [vmem:[%s6930_s8 + $0xec] sm:$0xf] }
 0x2aa   :  { %v3987_v34 = vor.u32 %v4526_v41, %v3984_v42  ;;  %v4435_v35 = vld [vmem:[%s6930_s8 + $0xc] sm:$0xf]  ;;  %v3844_v41 = vld [vmem:[%s6930_s8 + $0x1e4] sm:$0xf0]  ;;  %v3822_v42 = vld [vmem:[%s6930_s8 + $0x198] sm:$0xf] }
 0x2b1   :  { %v1468_v30 = vpop.permute.xlu1 %1467 }
 0x2b2   :  { %v1477_v61 = vmul.f32 %v1471_v50, %v1468_v30  ;;  %v1478_v62 = vmul.f32 %v1472_v51, %v1468_v30  ;;  %v1479_v63 = vmul.f32 %v1473_v53, %v1468_v30  ;;  %v3732_v50 = vld [vmem:[%s6930_s8 + $0x104] sm:$0xf0]  ;;  %v4519_v51 = vld [vmem:[%s6930_s8 + $0x2ac] sm:$0xf] }
 0x2b3   :  { %v3956_v53 = vld [vmem:[%s6930_s8 + $0x2c4] sm:$0xf0]  ;;  %v4571_v30 = vld [vmem:[%s6930_s8 + $0x448] sm:$0xf0] }
 0x2b4   :  { %v1480_v0 = vadd.f32 %v1477_v61, %v1461_v55  ;;  %v1481_v2 = vadd.f32 %v1478_v62, %v1462_v56  ;;  %v1482_v3 = vadd.f32 %v1479_v63, %v1463_v60  ;;  %v4180_v55 = vld [vmem:[%s6930_s8 + $0x484] sm:$0xf0]  ;;  %v4179_v56 = vor.u32 %v4578_v31, %v4178_v46  ;;  %v4456_v62 = vld [vmem:[%s6930_s8 + $0xb4] sm:$0xf]  ;;  %v3704_v63 = vld [vmem:[%s6930_s8 + $0xcc] sm:$0xf0] }
 0x2b5   :  { %v3959_v60 = vor.u32 %v4519_v51, %v3956_v53  ;;  %v4544_v31 = vld [vmem:[%s6930_s8 + $0x370] sm:$0xf0]  ;;  %v4485_v51 = vld [vmem:[%s6930_s8 + $0x19c] sm:$0xf]  ;;  %v3824_v53 = vld [vmem:[%s6930_s8 + $0x1b4] sm:$0xf0] }
 0x2b6   :  { %v1491_v4 = vadd.f32 %v1485_v54, %v1480_v0  ;;  %v1492_v5 = vadd.f32 %v1486_v57, %v1481_v2  ;;  %v1493_v6 = vadd.f32 %v1487_v59, %v1482_v3  ;;  %v4575_v54 = vld [vmem:[%s6930_s8 + $0x46c] sm:$0xf]  ;;  %v3735_v57 = vor.u32 %v4463_v49, %v3732_v50  ;;  %v4150_v59 = vld [vmem:[%s6930_s8 + $0x430] sm:$0xf]  ;;  %v4512_v0 = vld [vmem:[%s6930_s8 + $0x274] sm:$0xf] }
 0x2b7   :  { %v4183_v61 = vor.u32 %v4575_v54, %v4180_v55  ;;  %v3928_v2 = vld [vmem:[%s6930_s8 + $0x28c] sm:$0xf0]  ;;  %v4568_v3 = vld [vmem:[%s6930_s8 + $0x434] sm:$0xf]  ;;  %v3823_v50 = vor.u32 %v4488_v43, %v3822_v42  ;;  %v3712_v42 = vld [vmem:[%s6930_s8 + $0xd4] sm:$0xf0] }
 0x2b8   :  { %4619 = vtanh.f32 %v1491_v4  ;;  %v4152_v4 = vld [vmem:[%s6930_s8 + $0x44c] sm:$0xf0]  ;;  %v3931_v7 = vor.u32 %v4512_v0, %v3928_v2  ;;  %v4593_v0 = vld [vmem:[%s6930_s8 + $0x4f8] sm:$0xf0]  ;;  %v4478_v2 = vld [vmem:[%s6930_s8 + $0x164] sm:$0xf] }
 0x2b9   :  { %4621 = vtanh.f32 %v1492_v5  ;;  %v4151_v5 = vor.u32 %v4571_v30, %v4150_v59  ;;  %v4155_v8 = vor.u32 %v4568_v3, %v4152_v4  ;;  %v3794_v59 = vld [vmem:[%s6930_s8 + $0x160] sm:$0xf]  ;;  %v4481_v30 = vld [vmem:[%s6930_s8 + $0x178] sm:$0xf0] }
 0x2ba   :  { %4623 = vtanh.f32 %v1493_v6  ;;  %v3707_v6 = vor.u32 %v4456_v62, %v3704_v63  ;;  %v4537_v62 = vld [vmem:[%s6930_s8 + $0x338] sm:$0xf0]  ;;  %v4242_v63 = vld [vmem:[%s6930_s8 + $0x4e0] sm:$0xf]  ;;  %v3795_v4 = vor.u32 %v4481_v30, %v3794_v59  ;;  %v4446_v59 = vld [vmem:[%s6930_s8 + $0x60] sm:$0xf0] }
 0x2bb   :  { %v3796_v3 = vld [vmem:[%s6930_s8 + $0x17c] sm:$0xf0]  ;;  %v3878_v30 = vld [vmem:[%s6930_s8 + $0x208] sm:$0xf] }
 0x2be   :  { %v4620_v15 = vpop.eup %4619 }
 0x2bf   :  { %v4622_v17 = vpop.eup %4621  ;;  %v6279_v58 = vpack.c.bf16 %v4620_v15, %v4620_v15  ;;  %v4561_v15 = vld [vmem:[%s6930_s8 + $0x3fc] sm:$0xf] }
 0x2c0   :  { %v4624_v20 = vpop.eup %4623  ;;  %v6287_v21 = vpack.c.bf16 %v4622_v17, %v4622_v17  ;;  %v4123_v17 = vor.u32 %v4564_v1, %v4122_v13  ;;  %v3766_v13 = vld [vmem:[%s6930_s8 + $0x128] sm:$0xf]  ;;  %v4474_v1 = vld [vmem:[%s6930_s8 + $0x140] sm:$0xf0] }
 0x2c1   :  { %v6298_v26 = vpack.c.bf16 %v4624_v20, %v4624_v20  ;;  %2580 = vmatmul.bf16.vlgmr.msrb.gmra.mxu3 %v6279_v58  ;;  %2619 = vmatmul.bf16.vlgmr.msra.gmra.mxu1 %v6279_v58  ;;  %v3903_v20 = vor.u32 %v4505_v11, %v3900_v12  ;;  %v4586_v11 = vld [vmem:[%s6930_s8 + $0x4c0] sm:$0xf0]  ;;  %v4471_v12 = vld [vmem:[%s6930_s8 + $0x12c] sm:$0xf] }
 0x2c2   :  { %2593 = vmatmul.bf16.vlgmr.msra.gmra.mxu2 %v6287_v21  ;;  %2676 = vmatpush.bf16.msrb.mxu3 %v4263_v16  ;;  %v4124_v16 = vld [vmem:[%s6930_s8 + $0x414] sm:$0xf0] }
 0x2c3   :  { %2606 = vmatmul.bf16.vlgmr.msrb.gmra.mxu0 %v6298_v26  ;;  %2689 = vmatpush.bf16.msra.mxu2 %v3819_v18  ;;  %v3679_v18 = vor.u32 %v4449_v9, %v3676_v10  ;;  %v4530_v9 = vld [vmem:[%s6930_s8 + $0x300] sm:$0xf0]  ;;  %v4214_v10 = vld [vmem:[%s6930_s8 + $0x4a8] sm:$0xf] }
 0x2c4   :  { %2702 = vmatpush.bf16.msrb.mxu0 %v4043_v22  ;;  %2715 = vmatpush.bf16.msra.mxu1 %v4267_v23  ;;  %v4127_v22 = vor.u32 %v4561_v15, %v4124_v16  ;;  %v4442_v23 = vld [vmem:[%s6930_s8 + $0x44] sm:$0xf]  ;;  %v3768_v15 = vld [vmem:[%s6930_s8 + $0x144] sm:$0xf0]  ;;  %v3767_v16 = vor.u32 %v4474_v1, %v3766_v13  ;;  %v3850_v1 = vld [vmem:[%s6930_s8 + $0x1d0] sm:$0xf] }
 0x2c5   :  { %v3651_v33 = vor.u32 %v4442_v23, %v3648_v24  ;;  %v4523_v23 = vld [vmem:[%s6930_s8 + $0x2c8] sm:$0xf0]  ;;  %v4186_v24 = vld [vmem:[%s6930_s8 + $0x470] sm:$0xf] }
 0x2c6   :  { %2677 = vmatpush.bf16.msrb.mxu3 %v4235_v29  ;;  %v4066_v29 = vld [vmem:[%s6930_s8 + $0x388] sm:$0xf] }
 0x2c7   :  { %2690 = vmatpush.bf16.msra.mxu2 %v3791_v32  ;;  %v4550_v32 = vld [vmem:[%s6930_s8 + $0x3a0] sm:$0xf0] }
 0x2c8   :  { %2703 = vmatpush.bf16.msrb.mxu0 %v4015_v36  ;;  %2716 = vmatpush.bf16.msra.mxu1 %v4239_v37  ;;  %v3620_v36 = vld [vmem:[%s6930_s8 + $0x24] sm:$0xf0]  ;;  %v4491_v37 = vld [vmem:[%s6930_s8 + $0x1cc] sm:$0xf]  ;;  %v4067_v46 = vor.u32 %v4550_v32, %v4066_v29  ;;  %v4187_v29 = vor.u32 %v4579_v48, %v4186_v24  ;;  %v3710_v32 = vld [vmem:[%s6930_s8 + $0xb8] sm:$0xf] }
 0x2c9   :  { %v3623_v49 = vor.u32 %v4435_v35, %v3620_v36  ;;  %v3847_v54 = vor.u32 %v4491_v37, %v3844_v41  ;;  %v3934_v35 = vld [vmem:[%s6930_s8 + $0x278] sm:$0xf]  ;;  %v3743_v36 = vor.u32 %v4464_v25, %v3740_v40  ;;  %v4516_v37 = vld [vmem:[%s6930_s8 + $0x290] sm:$0xf0]  ;;  %v4457_v41 = vld [vmem:[%s6930_s8 + $0xbc] sm:$0xf] }
 0x2ca   :  { %2678 = vmatpush.bf16.msrb.mxu3 %v4207_v52  ;;  %v4068_v52 = vld [vmem:[%s6930_s8 + $0x3a4] sm:$0xf0]  ;;  %v4054_v24 = vld [vmem:[%s6930_s8 + $0x360] sm:$0xf]  ;;  %v4545_v48 = vld [vmem:[%s6930_s8 + $0x378] sm:$0xf0] }
 0x2cb   :  { %2691 = vmatpush.bf16.msra.mxu2 %v3763_v45  ;;  %v4046_v45 = vld [vmem:[%s6930_s8 + $0x358] sm:$0xf]  ;;  %v4071_v55 = vor.u32 %v4547_v44, %v4068_v52  ;;  %v3935_v44 = vor.u32 %v4516_v37, %v3934_v35  ;;  %v4055_v35 = vor.u32 %v4545_v48, %v4054_v24  ;;  %v3802_v37 = vld [vmem:[%s6930_s8 + $0x168] sm:$0xf]  ;;  %v4510_v48 = vld [vmem:[%s6930_s8 + $0x260] sm:$0xf0] }
 0x2cc   :  { %2704 = vmatpush.bf16.msrb.mxu0 %v3987_v34  ;;  %2717 = vmatpush.bf16.msra.mxu1 %v4211_v47  ;;  %v4270_v34 = vld [vmem:[%s6930_s8 + $0x518] sm:$0xf]  ;;  %v4600_v47 = vld [vmem:[%s6930_s8 + $0x530] sm:$0xf0]  ;;  %v3914_v24 = vld [vmem:[%s6930_s8 + $0x248] sm:$0xf] }
 0x2ce   :  { %2679 = vmatpush.bf16.msrb.mxu3 %v4179_v56  ;;  %v4047_v56 = vor.u32 %v4544_v31, %v4046_v45  ;;  %v3682_v45 = vld [vmem:[%s6930_s8 + $0x80] sm:$0xf] }
 0x2cf   :  { %2692 = vmatpush.bf16.msra.mxu2 %v3735_v57  ;;  %v4271_v57 = vor.u32 %v4600_v47, %v4270_v34  ;;  %v3906_v31 = vld [vmem:[%s6930_s8 + $0x240] sm:$0xf]  ;;  %v3715_v34 = vor.u32 %v4457_v41, %v3712_v42  ;;  %v4509_v47 = vld [vmem:[%s6930_s8 + $0x258] sm:$0xf0]  ;;  %v4538_v41 = vld [vmem:[%s6930_s8 + $0x340] sm:$0xf0] }
 0x2d0   :  { %2705 = vmatpush.bf16.msrb.mxu0 %v3959_v60  ;;  %2718 = vmatpush.bf16.msra.mxu1 %v4183_v61  ;;  %v4018_v60 = vld [vmem:[%s6930_s8 + $0x320] sm:$0xf]  ;;  %v3827_v61 = vor.u32 %v4485_v51, %v3824_v53  ;;  %v4450_v51 = vld [vmem:[%s6930_s8 + $0x84] sm:$0xf] }
 0x2d1   :  { %2632 = vmatmul.bf16.vlgmr.msra.gmra.mxu3 %v6287_v21  ;;  %2671 = vmatmul.bf16.vlgmr.msrb.gmra.mxu1 %v6287_v21  ;;  %v3684_v53 = vld [vmem:[%s6930_s8 + $0x9c] sm:$0xf0] }
 0x2d2   :  { %2645 = vmatmul.bf16.vlgmr.msrb.gmra.mxu2 %v6298_v26  ;;  %2680 = vmatpush.bf16.msrb.mxu3 %v4151_v5  ;;  %v4019_v5 = vor.u32 %v4537_v62, %v4018_v60  ;;  %v3687_v60 = vor.u32 %v4450_v51, %v3684_v53  ;;  %v4102_v62 = vld [vmem:[%s6930_s8 + $0x3c8] sm:$0xf]  ;;  %v4531_v51 = vld [vmem:[%s6930_s8 + $0x308] sm:$0xf0] }
 0x2d3   :  { %2658 = vmatmul.bf16.vlgmr.msra.gmra.mxu0 %v6279_v58  ;;  %2693 = vmatpush.bf16.msra.mxu2 %v3707_v6  ;;  %v4243_v6 = vor.u32 %v4593_v0, %v4242_v63  ;;  %v4558_v63 = vld [vmem:[%s6930_s8 + $0x3e0] sm:$0xf0]  ;;  %v4443_v0 = vld [vmem:[%s6930_s8 + $0x4c] sm:$0xf] }
 0x2d4   :  { %2706 = vmatpush.bf16.msrb.mxu0 %v3931_v7  ;;  %2719 = vmatpush.bf16.msra.mxu1 %v4155_v8  ;;  %v3990_v7 = vld [vmem:[%s6930_s8 + $0x2e8] sm:$0xf]  ;;  %v3799_v8 = vor.u32 %v4478_v2, %v3796_v3  ;;  %v4103_v13 = vor.u32 %v4558_v63, %v4102_v62  ;;  %v4468_v62 = vld [vmem:[%s6930_s8 + $0x110] sm:$0xf0]  ;;  %v3970_v63 = vld [vmem:[%s6930_s8 + $0x2b8] sm:$0xf] }
 0x2d5   :  { %v3656_v2 = vld [vmem:[%s6930_s8 + $0x64] sm:$0xf0] }
 0x2d6   :  { %2681 = vmatpush.bf16.msrb.mxu3 %v4123_v17  ;;  %v3991_v17 = vor.u32 %v4530_v9, %v3990_v7  ;;  %v4495_v7 = vld [vmem:[%s6930_s8 + $0x1e8] sm:$0xf0]  ;;  %v3659_v9 = vor.u32 %v4443_v0, %v3656_v2  ;;  %v4524_v0 = vld [vmem:[%s6930_s8 + $0x2d0] sm:$0xf0] }
 0x2d7   :  { %2694 = vmatpush.bf16.msra.mxu2 %v3679_v18  ;;  %v4215_v18 = vor.u32 %v4586_v11, %v4214_v10  ;;  %v4551_v10 = vld [vmem:[%s6930_s8 + $0x3a8] sm:$0xf0]  ;;  %v4436_v11 = vld [vmem:[%s6930_s8 + $0x14] sm:$0xf] }
 0x2d8   :  { %2707 = vmatpush.bf16.msrb.mxu0 %v3903_v20  ;;  %2720 = vmatpush.bf16.msra.mxu1 %v4127_v22  ;;  %v3962_v20 = vld [vmem:[%s6930_s8 + $0x2b0] sm:$0xf]  ;;  %v3771_v22 = vor.u32 %v4471_v12, %v3768_v15  ;;  %v4541_v15 = vld [vmem:[%s6930_s8 + $0x35c] sm:$0xf] }
 0x2d9   :  { %v3628_v12 = vld [vmem:[%s6930_s8 + $0x2c] sm:$0xf0] }
 0x2da   :  { %2682 = vmatpush.bf16.msrb.mxu3 %v4095_v28  ;;  %v3963_v28 = vor.u32 %v4523_v23, %v3962_v20  ;;  %v4489_v20 = vld [vmem:[%s6930_s8 + $0x1b8] sm:$0xf0]  ;;  %v3631_v25 = vor.u32 %v4436_v11, %v3628_v12 }
 0x2db   :  { %2695 = vmatpush.bf16.msra.mxu2 %v3651_v33  ;;  %v4460_v33 = vld [vmem:[%s6930_s8 + $0xd0] sm:$0xf0]  ;;  %v4517_v11 = vld [vmem:[%s6930_s8 + $0x298] sm:$0xf0] }
 0x2dc   :  { %2708 = vmatpush.bf16.msrb.mxu0 %v3875_v38  ;;  %2721 = vmatpush.bf16.msra.mxu1 %v4099_v39  ;;  %v4158_v38 = vld [vmem:[%s6930_s8 + $0x438] sm:$0xf]  ;;  %v4572_v39 = vld [vmem:[%s6930_s8 + $0x450] sm:$0xf0]  ;;  %v3711_v43 = vor.u32 %v4460_v33, %v3710_v32  ;;  %v4020_v32 = vld [vmem:[%s6930_s8 + $0x33c] sm:$0xf0] }
 0x2dd   :  { %v4159_v52 = vor.u32 %v4572_v39, %v4158_v38  ;;  %v4590_v33 = vld [vmem:[%s6930_s8 + $0x4e4] sm:$0xf]  ;;  %v4026_v39 = vld [vmem:[%s6930_s8 + $0x328] sm:$0xf] }
 0x2de   :  { %2683 = vmatpush.bf16.msrb.mxu3 %v4067_v46  ;;  %v4453_v46 = vld [vmem:[%s6930_s8 + $0x98] sm:$0xf0]  ;;  %v4482_v38 = vld [vmem:[%s6930_s8 + $0x180] sm:$0xf0] }
 0x2df   :  { %2696 = vmatpush.bf16.msra.mxu2 %v3623_v49  ;;  %v4130_v49 = vld [vmem:[%s6930_s8 + $0x400] sm:$0xf] }
 0x2e0   :  { %2709 = vmatpush.bf16.msrb.mxu0 %v3847_v54  ;;  %2722 = vmatpush.bf16.msra.mxu1 %v4071_v55  ;;  %v3683_v54 = vor.u32 %v4453_v46, %v3682_v45  ;;  %v3907_v55 = vor.u32 %v4509_v47, %v3906_v31  ;;  %v3992_v45 = vld [vmem:[%s6930_s8 + $0x304] sm:$0xf0]  ;;  %v4583_v46 = vld [vmem:[%s6930_s8 + $0x4ac] sm:$0xf]  ;;  %v4027_v31 = vor.u32 %v4538_v41, %v4026_v39  ;;  %v3774_v47 = vld [vmem:[%s6930_s8 + $0x130] sm:$0xf] }
 0x2e1   :  { %2684 = vmatmul.bf16.vlgmr.msrb.gmra.mxu3 %v6298_v26  ;;  %v4503_v39 = vld [vmem:[%s6930_s8 + $0x228] sm:$0xf0] }
 0x2e2   :  { %2728 = vmatpush.bf16.msra.mxu3 %v3823_v50  ;;  %2697 = vmatmul.bf16.vlgmr.msra.gmra.mxu2 %v6279_v58  ;;  %v4565_v50 = vld [vmem:[%s6930_s8 + $0x418] sm:$0xf0] }
 0x2e3   :  { %2741 = vmatpush.bf16.msrb.mxu2 %v4047_v56  ;;  %2710 = vmatmul.bf16.vlgmr.msrb.gmra.mxu0 %v6287_v21  ;;  %v4131_v56 = vor.u32 %v4565_v50, %v4130_v49  ;;  %v4475_v49 = vld [vmem:[%s6930_s8 + $0x148] sm:$0xf0]  ;;  %v3998_v50 = vld [vmem:[%s6930_s8 + $0x2f0] sm:$0xf] }
 0x2e4   :  { %2754 = vmatpush.bf16.msra.mxu0 %v4271_v57  ;;  %2767 = vmatpush.bf16.msrb.mxu1 %v3827_v61  ;;  %v3654_v57 = vld [vmem:[%s6930_s8 + $0x48] sm:$0xf]  ;;  %v4502_v61 = vld [vmem:[%s6930_s8 + $0x220] sm:$0xf0] }
 0x2e5   :  { %2723 = vmatmul.bf16.vlgmr.msra.gmra.mxu1 %v6298_v26  ;;  %v3655_v3 = vor.u32 %v4446_v59, %v3654_v57  ;;  %v3964_v57 = vld [vmem:[%s6930_s8 + $0x2cc] sm:$0xf0]  ;;  %v4576_v59 = vld [vmem:[%s6930_s8 + $0x474] sm:$0xf] }
 0x2e6   :  { %2729 = vmatpush.bf16.msra.mxu3 %v3795_v4  ;;  %v3626_v4 = vld [vmem:[%s6930_s8 + $0x10] sm:$0xf] }
 0x2e7   :  { %2742 = vmatpush.bf16.msrb.mxu2 %v4019_v5  ;;  %v4439_v5 = vld [vmem:[%s6930_s8 + $0x28] sm:$0xf0] }
 0x2e8   :  { %2755 = vmatpush.bf16.msra.mxu0 %v4243_v6  ;;  %2768 = vmatpush.bf16.msrb.mxu1 %v3799_v8  ;;  %v3879_v6 = vor.u32 %v4502_v61, %v3878_v30  ;;  %v4074_v8 = vld [vmem:[%s6930_s8 + $0x390] sm:$0xf]  ;;  %v3999_v30 = vor.u32 %v4531_v51, %v3998_v50  ;;  %v3746_v61 = vld [vmem:[%s6930_s8 + $0xf8] sm:$0xf]  ;;  %v4496_v50 = vld [vmem:[%s6930_s8 + $0x1f0] sm:$0xf0] }
 0x2e9   :  { %v4075_v23 = vor.u32 %v4551_v10, %v4074_v8  ;;  %v3718_v8 = vld [vmem:[%s6930_s8 + $0xc0] sm:$0xf] }
 0x2ea   :  { %2730 = vmatpush.bf16.msra.mxu3 %v3767_v16  ;;  %v4048_v16 = vld [vmem:[%s6930_s8 + $0x374] sm:$0xf0]  ;;  %v3942_v10 = vld [vmem:[%s6930_s8 + $0x280] sm:$0xf] }
 0x2eb   :  { %2743 = vmatpush.bf16.msrb.mxu2 %v3991_v17  ;;  %v4597_v17 = vld [vmem:[%s6930_s8 + $0x51c] sm:$0xf]  ;;  %v4051_v40 = vor.u32 %v4541_v15, %v4048_v16  ;;  %v4278_v51 = vld [vmem:[%s6930_s8 + $0x520] sm:$0xf] }
 0x2ec   :  { %2756 = vmatpush.bf16.msra.mxu0 %v4215_v18  ;;  %2769 = vmatpush.bf16.msrb.mxu1 %v3771_v22  ;;  %v3627_v18 = vor.u32 %v4439_v5, %v3626_v4  ;;  %v3851_v22 = vor.u32 %v4495_v7, %v3850_v1  ;;  %v3747_v4 = vor.u32 %v4468_v62, %v3746_v61  ;;  %v4513_v5 = vld [vmem:[%s6930_s8 + $0x27c] sm:$0xf]  ;;  %v4160_v7 = vld [vmem:[%s6930_s8 + $0x454] sm:$0xf0]  ;;  %v4222_v62 = vld [vmem:[%s6930_s8 + $0x4b0] sm:$0xf] }
 0x2ed   :  { %v3971_v1 = vor.u32 %v4524_v0, %v3970_v63  ;;  %v4587_v63 = vld [vmem:[%s6930_s8 + $0x4c8] sm:$0xf0] }
 0x2ee   :  { %2731 = vmatpush.bf16.msra.mxu3 %v3739_v27  ;;  %v4275_v27 = vor.u32 %v4597_v17, %v4272_v19  ;;  %v4506_v17 = vld [vmem:[%s6930_s8 + $0x244] sm:$0xf]  ;;  %v4223_v0 = vor.u32 %v4587_v63, %v4222_v62 }
 0x2ef   :  { %2744 = vmatpush.bf16.msrb.mxu2 %v3963_v28  ;;  %v3831_v28 = vor.u32 %v4489_v20, %v3830_v14  ;;  %v4562_v19 = vld [vmem:[%s6930_s8 + $0x404] sm:$0xf]  ;;  %v3943_v14 = vor.u32 %v4517_v11, %v3942_v10  ;;  %v4132_v20 = vld [vmem:[%s6930_s8 + $0x41c] sm:$0xf0]  ;;  %v4082_v10 = vld [vmem:[%s6930_s8 + $0x398] sm:$0xf] }
 0x2f0   :  { %2757 = vmatpush.bf16.msra.mxu0 %v4187_v29  ;;  %2770 = vmatpush.bf16.msrb.mxu1 %v3743_v36  ;;  %v4534_v29 = vld [vmem:[%s6930_s8 + $0x324] sm:$0xf]  ;;  %v4244_v36 = vld [vmem:[%s6930_s8 + $0x4fc] sm:$0xf0]  ;;  %v4552_v11 = vld [vmem:[%s6930_s8 + $0x3b0] sm:$0xf0] }
 0x2f1   :  { %v4023_v42 = vor.u32 %v4534_v29, %v4020_v32  ;;  %v3880_v29 = vld [vmem:[%s6930_s8 + $0x224] sm:$0xf0]  ;;  %v4555_v32 = vld [vmem:[%s6930_s8 + $0x3cc] sm:$0xf] }
 0x2f2   :  { %2732 = vmatpush.bf16.msra.mxu3 %v3711_v43  ;;  %v4247_v43 = vor.u32 %v4590_v33, %v4244_v36  ;;  %v3915_v33 = vor.u32 %v4510_v48, %v3914_v24  ;;  %v3662_v36 = vld [vmem:[%s6930_s8 + $0x50] sm:$0xf] }
 0x2f3   :  { %2745 = vmatpush.bf16.msrb.mxu2 %v3935_v44  ;;  %v3803_v44 = vor.u32 %v4482_v38, %v3802_v37  ;;  %v4447_v37 = vld [vmem:[%s6930_s8 + $0x68] sm:$0xf0]  ;;  %v3886_v38 = vld [vmem:[%s6930_s8 + $0x210] sm:$0xf] }
 0x2f4   :  { %2758 = vmatpush.bf16.msra.mxu0 %v4159_v52  ;;  %2771 = vmatpush.bf16.msrb.mxu1 %v3715_v34  ;;  %v4527_v52 = vld [vmem:[%s6930_s8 + $0x2ec] sm:$0xf]  ;;  %v4216_v34 = vld [vmem:[%s6930_s8 + $0x4c4] sm:$0xf0] }
 0x2f5   :  { %v3995_v53 = vor.u32 %v4527_v52, %v3992_v45  ;;  %v3852_v52 = vld [vmem:[%s6930_s8 + $0x1ec] sm:$0xf0]  ;;  %v4548_v45 = vld [vmem:[%s6930_s8 + $0x394] sm:$0xf] }
 0x2f6   :  { %2733 = vmatpush.bf16.msra.mxu3 %v3683_v54  ;;  %v4219_v54 = vor.u32 %v4583_v46, %v4216_v34  ;;  %v4076_v46 = vld [vmem:[%s6930_s8 + $0x3ac] sm:$0xf0]  ;;  %v3634_v34 = vld [vmem:[%s6930_s8 + $0x18] sm:$0xf] }
 0x2f7   :  { %2746 = vmatpush.bf16.msrb.mxu2 %v3907_v55  ;;  %v3775_v55 = vor.u32 %v4475_v49, %v3774_v47  ;;  %v4440_v47 = vld [vmem:[%s6930_s8 + $0x30] sm:$0xf0]  ;;  %v3858_v49 = vld [vmem:[%s6930_s8 + $0x1d8] sm:$0xf] }
 0x2f8   :  { %2759 = vmatpush.bf16.msra.mxu0 %v4131_v56  ;;  %2772 = vmatpush.bf16.msrb.mxu1 %v3687_v60  ;;  %v4520_v56 = vld [vmem:[%s6930_s8 + $0x2b4] sm:$0xf]  ;;  %v4188_v60 = vld [vmem:[%s6930_s8 + $0x48c] sm:$0xf0] }
 0x2f9   :  { %v3967_v2 = vor.u32 %v4520_v56, %v3964_v57  ;;  %v3635_v56 = vor.u32 %v4440_v47, %v3634_v34  ;;  %v3859_v57 = vor.u32 %v4496_v50, %v3858_v49 }
 0x2fa   :  { %2734 = vmatpush.bf16.msra.mxu3 %v3655_v3  ;;  %v4191_v3 = vor.u32 %v4576_v59, %v4188_v60  ;;  %v4594_v60 = vld [vmem:[%s6930_s8 + $0x500] sm:$0xf0] }
 0x2fb   :  { %2747 = vmatpush.bf16.msrb.mxu2 %v3879_v6  ;;  %v3936_v6 = vld [vmem:[%s6930_s8 + $0x294] sm:$0xf0] }
 0x2fc   :  { %2760 = vmatpush.bf16.msra.mxu0 %v4103_v13  ;;  %2773 = vmatpush.bf16.msrb.mxu1 %v3659_v9  ;;  %v4569_v13 = vld [vmem:[%s6930_s8 + $0x43c] sm:$0xf]  ;;  %v3939_v12 = vor.u32 %v4513_v5, %v3936_v6  ;;  %v4166_v5 = vld [vmem:[%s6930_s8 + $0x440] sm:$0xf]  ;;  %v4138_v6 = vld [vmem:[%s6930_s8 + $0x408] sm:$0xf] }
 0x2fd   :  { %v4461_v9 = vld [vmem:[%s6930_s8 + $0xd8] sm:$0xf0]  ;;  %v4163_v15 = vor.u32 %v4569_v13, %v4160_v7  ;;  %v4566_v13 = vld [vmem:[%s6930_s8 + $0x420] sm:$0xf0]  ;;  %v4110_v7 = vld [vmem:[%s6930_s8 + $0x3d0] sm:$0xf] }
 0x2fe   :  { %2735 = vmatpush.bf16.msra.mxu3 %v3627_v18  ;;  %v3719_v16 = vor.u32 %v4461_v9, %v3718_v8  ;;  %v3908_v18 = vld [vmem:[%s6930_s8 + $0x25c] sm:$0xf0]  ;;  %v4559_v8 = vld [vmem:[%s6930_s8 + $0x3e8] sm:$0xf0] }
 0x2ff   :  { %2748 = vmatpush.bf16.msrb.mxu2 %v3851_v22  ;;  %v3690_v22 = vld [vmem:[%s6930_s8 + $0x88] sm:$0xf]  ;;  %v4111_v9 = vor.u32 %v4559_v8, %v4110_v7 }
 0x300   :  { %2761 = vmatpush.bf16.msra.mxu0 %v4075_v23  ;;  %2774 = vmatpush.bf16.msrb.mxu1 %v3631_v25  ;;  %v4454_v23 = vld [vmem:[%s6930_s8 + $0xa0] sm:$0xf0]  ;;  %v3911_v25 = vor.u32 %v4506_v17, %v3908_v18 }
 0x301   :  { %2736 = vmatmul.bf16.vlgmr.msra.gmra.mxu3 %v6279_v58  ;;  %v6909_v17 = vld [vmem:[%s6931_s9] sm:$0x7f] }
 0x302   :  { %2780 = vmatpush.bf16.msrb.mxu3 %v4051_v40  ;;  %2749 = vmatmul.bf16.vlgmr.msrb.gmra.mxu2 %v6287_v21  ;;  %v4135_v40 = vor.u32 %v4562_v19, %v4132_v20  ;;  %v1694_v18 = vperm.slane %v6909_v17, 0 }
 0x303   :  { %2793 = vmatpush.bf16.msra.mxu2 %v4275_v27  ;;  %2762 = vmatmul.bf16.vlgmr.msra.gmra.mxu0 %v6298_v26  ;;  %v3691_v27 = vor.u32 %v4454_v23, %v3690_v22 }
 0x304   :  { %2806 = vmatpush.bf16.msrb.mxu0 %v3831_v28  ;;  %2819 = vmatpush.bf16.msra.mxu1 %v4055_v35  ;;  %v4499_v28 = vld [vmem:[%s6930_s8 + $0x20c] sm:$0xf]  ;;  %v4104_v35 = vld [vmem:[%s6930_s8 + $0x3e4] sm:$0xf0] }
 0x305   :  { %2775 = vmatmul.bf16.vlgmr.msrb.gmra.mxu1 %v6279_v58  ;;  %v3883_v41 = vor.u32 %v4499_v28, %v3880_v29  ;;  %v1695_v28 = vperm.slane %v6909_v17, 1 }
 0x306   :  { %2781 = vmatpush.bf16.msrb.mxu3 %v4023_v42  ;;  %v4492_v42 = vld [vmem:[%s6930_s8 + $0x1d4] sm:$0xf] }
 0x307   :  { %2794 = vmatpush.bf16.msra.mxu2 %v4247_v43  ;;  %v4107_v43 = vor.u32 %v4555_v32, %v4104_v35 }
 0x308   :  { %2807 = vmatpush.bf16.msrb.mxu0 %v3803_v44  ;;  %2820 = vmatpush.bf16.msra.mxu1 %v4027_v31  ;;  %v3663_v44 = vor.u32 %v4447_v37, %v3662_v36  ;;  %v3887_v31 = vor.u32 %v4503_v39, %v3886_v38 }
 0x30a   :  { %2782 = vmatpush.bf16.msrb.mxu3 %v3995_v53  ;;  %v4601_v53 = vld [vmem:[%s6930_s8 + $0x538] sm:$0xf0] }
 0x30b   :  { %2795 = vmatpush.bf16.msra.mxu2 %v4219_v54  ;;  %v3855_v54 = vor.u32 %v4492_v42, %v3852_v52  ;;  %v4279_v59 = vor.u32 %v4601_v53, %v4278_v51  ;;  %v1696_v52 = vperm.slane %v6909_v17, 2 }
 0x30c   :  { %2808 = vmatpush.bf16.msrb.mxu0 %v3775_v55  ;;  %2821 = vmatpush.bf16.msra.mxu1 %v3999_v30  ;;  %v4079_v55 = vor.u32 %v4548_v45, %v4076_v46  ;;  %v4250_v30 = vld [vmem:[%s6930_s8 + $0x4e8] sm:$0xf] }
 0x30d   :  { %v4251_v61 = vor.u32 %v4594_v60, %v4250_v30 }
 0x30e   :  { %2783 = vmatpush.bf16.msrb.mxu3 %v3967_v2  ;;  %v4194_v2 = vld [vmem:[%s6930_s8 + $0x478] sm:$0xf] }
 0x30f   :  { %2796 = vmatpush.bf16.msra.mxu2 %v4191_v3  ;;  %v4580_v3 = vld [vmem:[%s6930_s8 + $0x490] sm:$0xf0] }
 0x310   :  { %2809 = vmatpush.bf16.msrb.mxu0 %v3747_v4  ;;  %2822 = vmatpush.bf16.msra.mxu1 %v3971_v1  ;;  %v4195_v4 = vor.u32 %v4580_v3, %v4194_v2  ;;  %v4139_v1 = vor.u32 %v4566_v13, %v4138_v6 }
 0x312   :  { %2784 = vmatpush.bf16.msrb.mxu3 %v3939_v12  ;;  %v4083_v12 = vor.u32 %v4552_v11, %v4082_v10 }
 0x313   :  { %2797 = vmatpush.bf16.msra.mxu2 %v4163_v15 }
 0x314   :  { %2810 = vmatpush.bf16.msrb.mxu0 %v3719_v16  ;;  %2823 = vmatpush.bf16.msra.mxu1 %v3943_v14 }
 0x316   :  { %2785 = vmatpush.bf16.msrb.mxu3 %v3911_v25 }
 0x317   :  { %2798 = vmatpush.bf16.msra.mxu2 %v4135_v40 }
 0x318   :  { %2811 = vmatpush.bf16.msrb.mxu0 %v3691_v27  ;;  %2824 = vmatpush.bf16.msra.mxu1 %v3915_v33 }
 0x31a   :  { %2786 = vmatpush.bf16.msrb.mxu3 %v3883_v41 }
 0x31b   :  { %2799 = vmatpush.bf16.msra.mxu2 %v4107_v43 }
 0x31c   :  { %2812 = vmatpush.bf16.msrb.mxu0 %v3663_v44  ;;  %2825 = vmatpush.bf16.msra.mxu1 %v3887_v31 }
 0x31e   :  { %2787 = vmatpush.bf16.msrb.mxu3 %v3855_v54 }
 0x31f   :  { %2800 = vmatpush.bf16.msra.mxu2 %v4079_v55 }
 0x320   :  { %2813 = vmatpush.bf16.msrb.mxu0 %v3635_v56  ;;  %2826 = vmatpush.bf16.msra.mxu1 %v3859_v57 }
 0x321   :  { %2788 = vmatmul.bf16.vlgmr.msrb.gmra.mxu3 %v6287_v21 }
 0x322   :  { %2832 = vmatpush.bf16.msra.mxu3 %v4279_v59  ;;  %2801 = vmatmul.bf16.vlgmr.msra.gmra.mxu2 %v6298_v26  ;;  %v1697_v59 = vperm.slane %v6909_v17, 3 }
 0x323   :  { %2814 = vmatmul.bf16.vlgmr.msrb.gmra.mxu0 %v6279_v58  ;;  %2827 = vmatmul.bf16.vlgmr.msra.gmra.mxu1 %v6287_v21  ;;  %v4573_v58 = vld [vmem:[%s6930_s8 + $0x458] sm:$0xf0]  ;;  %s4683_s8 = smov [#allocation2]  }
 0x324   :  { %v4167_v21 = vor.u32 %v4573_v58, %v4166_v5  ;;  %s2997_s9 = sshll.u32 %s4683_s8, 4  ;;  %s2998_s9 = int_to_ptr.vmem [resolvable:$true] %s2997_s9 }
 0x326   :  { %2833 = vmatpush.bf16.msra.mxu3 %v4251_v61 }
 0x32a   :  { %2834 = vmatpush.bf16.msra.mxu3 %v4223_v0 }
 0x32e   :  { %2835 = vmatpush.bf16.msra.mxu3 %v4195_v4 }
 0x332   :  { %2836 = vmatpush.bf16.msra.mxu3 %v4167_v21 }
 0x336   :  { %2837 = vmatpush.bf16.msra.mxu3 %v4139_v1 }
 0x33a   :  { %2838 = vmatpush.bf16.msra.mxu3 %v4111_v9 }
 0x33e   :  { %2839 = vmatpush.bf16.msra.mxu3 %v4083_v12  ;;  %v2620_v15 = vpop.f32.mrf.mxu1 }
 0x33f   :  { %v2621_v33 = vadd.f32 %v2620_v15, %v1695_v28 }
 0x340   :  { %v2607_v16 = vpop.f32.mrf.mxu0 }
 0x341   :  { %2840 = vmatmul.bf16.vlgmr.msra.gmra.mxu3 %v6298_v26 }
 0x344   :  { %v2581_v19 = vpop.f32.mrf.mxu3 }
 0x345   :  { %v2582_v14 = vadd.f32 %v2581_v19, %v1694_v18  ;;  %v2594_v20 = vpop.f32.mrf.mxu2 }
 0x346   :  { %v2622_v22 = vpop.f32.mrf.mxu1 }
 0x347   :  { %v2595_v23 = vadd.f32 %v2594_v20, %v2582_v14 }
 0x348   :  { %v2609_v24 = vpop.f32.mrf.mxu0 }
 0x349   :  { %v2608_v48 = vadd.f32 %v2607_v16, %v2595_v23 }
 0x34b   :  { %v4280_v25 = vmul.f32 -1.442695, %v2608_v48 }
 0x34c   :  { %v2583_v40 = vpop.f32.mrf.mxu3 }
 0x34d   :  { %4625 = vpow2.f32 %v4280_v25  ;;  %v2596_v26 = vpop.f32.mrf.mxu2 }
 0x34e   :  { %v2672_v27 = vpop.f32.mrf.mxu1 }
 0x350   :  { %v2659_v29 = vpop.f32.mrf.mxu0 }
 0x351   :  { %v2660_v49 = vadd.f32 %v2659_v29, %v1696_v52 }
 0x353   :  { %v4626_v32 = vpop.eup %4625  ;;  %v2673_v60 = vadd.f32 %v2672_v27, %v2660_v49 }
 0x354   :  { %v2866_v35 = vadd.f32 1.0, %v4626_v32  ;;  %v2633_v36 = vpop.f32.mrf.mxu3 }
 0x355   :  { %v2634_v37 = vadd.f32 %v2633_v36, %v2621_v33  ;;  %v2646_v38 = vpop.f32.mrf.mxu2 }
 0x356   :  { %4627 = vrcp.f32 %v2866_v35  ;;  %v2674_v39 = vpop.f32.mrf.mxu1  ;;  %v2884_v47 = vand.u32 2147483648, %v2866_v35  ;;  %v2882_v54 = vand.u32 2147483647, %v2866_v35  ;;  %vm2878_vm3 = vweird.f32 %v2866_v35 }
 0x357   :  { %v2647_v41 = vadd.f32 %v2646_v38, %v2634_v37  ;;  %v1698_v37 = vperm.slane %v6909_v17, 4 }
 0x358   :  { %v2661_v42 = vpop.f32.mrf.mxu0  ;;  %v2885_v30 = vor.u32 1.1754944e-38, %v2884_v47  ;;  %vm2883_vm5 = vcmp.eq.f32.partialorder %v2882_v54, 8.507059e+37 }
 0x359   :  { %v4281_v43 = vmul.f32 -1.442695, %v2647_v41 }
 0x35b   :  { %4629 = vpow2.f32 %v4281_v43 }
 0x35c   :  { %v4628_v44 = vpop.eup %4627  ;;  %v2635_v45 = vpop.f32.mrf.mxu3 }
 0x35d   :  { %v2874_v46 = vmul.f32 %v4628_v44, %v2866_v35  ;;  %v2648_v31 = vpop.f32.mrf.mxu2  ;;  %vm2879_vm2 = vweird.f32 %v4628_v44 }
 0x35e   :  { %vm2880_vm4 = vmor %vm2878_vm3, %vm2879_vm2 }
 0x35f   :  { %v2875_v34 = vsub.f32 1.0, %v2874_v46 }
 0x360   :  { %v2711_v50 = vpop.f32.mrf.mxu0 }
 0x361   :  { %v4630_v51 = vpop.eup %4629  ;;  %v2876_v53 = vmul.f32 %v4628_v44, %v2875_v34 }
 0x362   :  { %v2724_v55 = vpop.f32.mrf.mxu1  ;;  %v2867_v56 = vadd.f32 1.0, %v4630_v51 }
 0x363   :  { %v2877_v57 = vadd.f32 %v4628_v44, %v2876_v53 }
 0x364   :  { %4631 = vrcp.f32 %v2867_v56  ;;  %v2685_v62 = vpop.f32.mrf.mxu3  ;;  %v2899_v10 = vand.u32 2147483648, %v2867_v56  ;;  %v2897_v15 = vand.u32 2147483647, %v2867_v56  ;;  %vm2893_vm7 = vweird.f32 %v2867_v56 }
 0x365   :  { %v2881_v61 = vsel %vm2880_vm4, %v4628_v44, %v2877_v57  ;;  %v2686_v0 = vadd.f32 %v2685_v62, %v2673_v60  ;;  %v2698_v2 = vpop.f32.mrf.mxu2  ;;  %v1699_v62 = vperm.slane %v6909_v17, 5 }
 0x366   :  { %v2886_v63 = vsel %vm2883_vm5, %v2885_v30, %v2881_v61  ;;  %v2699_v3 = vadd.f32 %v2698_v2, %v1697_v59  ;;  %v2900_v14 = vor.u32 1.1754944e-38, %v2899_v10  ;;  %vm2898_vm9 = vcmp.eq.f32.partialorder %v2897_v15, 8.507059e+37 }
 0x367   :  { %2978 = vst [vmem:[#allocation2] sm:$0xff] %v2886_v63  ;;  %v4282_v4 = vmul.f32 -1.442695, %v2686_v0 }
 0x368   :  { %v2713_v5 = vpop.f32.mrf.mxu0  ;;  %v2712_v58 = vadd.f32 %v2711_v50, %v2699_v3 }
 0x369   :  { %4633 = vpow2.f32 %v4282_v4 }
 0x36a   :  { %v2726_v21 = vpop.f32.mrf.mxu1  ;;  %v4632_v6 = vpop.eup %4631  ;;  %v2725_v1 = vadd.f32 %v2724_v55, %v2712_v58 }
 0x36b   :  { %v2889_v13 = vmul.f32 %v4632_v6, %v2867_v56  ;;  %vm2894_vm6 = vweird.f32 %v4632_v6 }
 0x36c   :  { %v4283_v8 = vmul.f32 -1.442695, %v2725_v1  ;;  %v2687_v9 = vpop.f32.mrf.mxu3  ;;  %vm2895_vm8 = vmor %vm2893_vm7, %vm2894_vm6 }
 0x36d   :  { %v2890_v7 = vsub.f32 1.0, %v2889_v13  ;;  %v2700_v11 = vpop.f32.mrf.mxu2 }
 0x36e   :  { %4635 = vpow2.f32 %v4283_v8 }
 0x36f   :  { %v2891_v12 = vmul.f32 %v4632_v6, %v2890_v7  ;;  %v4634_v16 = vpop.eup %4633 }
 0x370   :  { %v2868_v19 = vadd.f32 1.0, %v4634_v16 }
 0x371   :  { %v2892_v18 = vadd.f32 %v4632_v6, %v2891_v12 }
 0x372   :  { %4637 = vrcp.f32 %v2868_v19  ;;  %v2914_v26 = vand.u32 2147483648, %v2868_v19  ;;  %v2912_v29 = vand.u32 2147483647, %v2868_v19  ;;  %vm2908_vm11 = vweird.f32 %v2868_v19 }
 0x373   :  { %v2896_v20 = vsel %vm2895_vm8, %v4632_v6, %v2892_v18 }
 0x374   :  { %v2901_v22 = vsel %vm2898_vm9, %v2900_v14, %v2896_v20  ;;  %v4636_v23 = vpop.eup %4635  ;;  %v2915_v38 = vor.u32 1.1754944e-38, %v2914_v26  ;;  %vm2913_vm13 = vcmp.eq.f32.partialorder %v2912_v29, 8.507059e+37 }
 0x375   :  { %2979 = vst [vmem:[#allocation2 + $0x8] sm:$0xff] %v2901_v22  ;;  %v2869_v24 = vadd.f32 1.0, %v4636_v23  ;;  %v1700_v22 = vperm.slane %v6909_v17, 6 }
 0x377   :  { %4639 = vrcp.f32 %v2869_v24  ;;  %v2929_v42 = vand.u32 2147483648, %v2869_v24  ;;  %v2927_v52 = vand.u32 2147483647, %v2869_v24  ;;  %vm2923_vm15 = vweird.f32 %v2869_v24 }
 0x378   :  { %v4638_v48 = vpop.eup %4637 }
 0x379   :  { %v2904_v25 = vmul.f32 %v4638_v48, %v2868_v19  ;;  %vm2909_vm10 = vweird.f32 %v4638_v48  ;;  %v2930_v47 = vor.u32 1.1754944e-38, %v2929_v42  ;;  %vm2928_vm2 = vcmp.eq.f32.partialorder %v2927_v52, 8.507059e+37 }
 0x37a   :  { %vm2910_vm12 = vmor %vm2908_vm11, %vm2909_vm10 }
 0x37b   :  { %v2905_v40 = vsub.f32 1.0, %v2904_v25 }
 0x37d   :  { %v4640_v27 = vpop.eup %4639  ;;  %v2906_v28 = vmul.f32 %v4638_v48, %v2905_v40 }
 0x37e   :  { %v2919_v33 = vmul.f32 %v4640_v27, %v2869_v24  ;;  %vm2924_vm14 = vweird.f32 %v4640_v27 }
 0x37f   :  { %v2907_v36 = vadd.f32 %v4638_v48, %v2906_v28  ;;  %vm2925_vm1 = vmor %vm2923_vm15, %vm2924_vm14 }
 0x380   :  { %v2763_v32 = vpop.f32.mrf.mxu0  ;;  %v2920_v39 = vsub.f32 1.0, %v2919_v33 }
 0x381   :  { %v2911_v41 = vsel %vm2910_vm12, %v4638_v48, %v2907_v36 }
 0x382   :  { %v2776_v35 = vpop.f32.mrf.mxu1  ;;  %v2916_v43 = vsel %vm2913_vm13, %v2915_v38, %v2911_v41  ;;  %v2921_v44 = vmul.f32 %v4640_v27, %v2920_v39 }
 0x383   :  { %2980 = vst [vmem:[#allocation2 + $0x10] sm:$0xff] %v2916_v43  ;;  %v2777_v4 = vadd.f32 %v2776_v35, %v1699_v62 }
 0x384   :  { %v2737_v45 = vpop.f32.mrf.mxu3  ;;  %v2922_v34 = vadd.f32 %v4640_v27, %v2921_v44 }
 0x385   :  { %v2738_v46 = vadd.f32 %v2737_v45, %v1698_v37  ;;  %v2750_v31 = vpop.f32.mrf.mxu2 }
 0x386   :  { %v2926_v51 = vsel %vm2925_vm1, %v4640_v27, %v2922_v34 }
 0x387   :  { %v2751_v49 = vadd.f32 %v2750_v31, %v2738_v46  ;;  %v2931_v54 = vsel %vm2928_vm2, %v2930_v47, %v2926_v51 }
 0x388   :  { %v2765_v50 = vpop.f32.mrf.mxu0  ;;  %2981 = vst [vmem:[#allocation2 + $0x18] sm:$0xff] %v2931_v54 }
 0x389   :  { %v2764_v55 = vadd.f32 %v2763_v32, %v2751_v49 }
 0x38a   :  { %v2778_v53 = vpop.f32.mrf.mxu1 }
 0x38b   :  { %v4284_v56 = vmul.f32 -1.442695, %v2764_v55 }
 0x38c   :  { %v2739_v57 = vpop.f32.mrf.mxu3 }
 0x38d   :  { %4641 = vpow2.f32 %v4284_v56  ;;  %v2752_v59 = vpop.f32.mrf.mxu2 }
 0x393   :  { %v4642_v30 = vpop.eup %4641 }
 0x394   :  { %v2870_v60 = vadd.f32 1.0, %v4642_v30 }
 0x396   :  { %4643 = vrcp.f32 %v2870_v60  ;;  %v2944_v5 = vand.u32 2147483648, %v2870_v60  ;;  %v2942_v21 = vand.u32 2147483647, %v2870_v60  ;;  %vm2938_vm4 = vweird.f32 %v2870_v60 }
 0x398   :  { %v2945_v8 = vor.u32 1.1754944e-38, %v2944_v5  ;;  %vm2943_vm6 = vcmp.eq.f32.partialorder %v2942_v21, 8.507059e+37 }
 0x39c   :  { %v4644_v61 = vpop.eup %4643 }
 0x39d   :  { %v2934_v0 = vmul.f32 %v4644_v61, %v2870_v60  ;;  %vm2939_vm3 = vweird.f32 %v4644_v61 }
 0x39e   :  { %vm2940_vm5 = vmor %vm2938_vm4, %vm2939_vm3 }
 0x39f   :  { %v2935_v3 = vsub.f32 1.0, %v2934_v0 }
 0x3a0   :  { %v2815_v63 = vpop.f32.mrf.mxu0  ;;  %v2828_v2 = vpop.f32.mrf.mxu1 }
 0x3a1   :  { %v2936_v58 = vmul.f32 %v4644_v61, %v2935_v3  ;;  %v2816_v48 = vadd.f32 %v2815_v63, %v1700_v22 }
 0x3a3   :  { %v2937_v7 = vadd.f32 %v4644_v61, %v2936_v58  ;;  %v2829_v28 = vadd.f32 %v2828_v2, %v2816_v48 }
 0x3a4   :  { %v2789_v6 = vpop.f32.mrf.mxu3 }
 0x3a5   :  { %v2790_v13 = vadd.f32 %v2789_v6, %v2777_v4  ;;  %v2802_v1 = vpop.f32.mrf.mxu2  ;;  %v2941_v11 = vsel %vm2940_vm5, %v4644_v61, %v2937_v7 }
 0x3a6   :  { %v2946_v15 = vsel %vm2943_vm6, %v2945_v8, %v2941_v11 }
 0x3a7   :  { %v2803_v9 = vadd.f32 %v2802_v1, %v2790_v13  ;;  %2982 = vst [vmem:[#allocation2 + $0x20] sm:$0xff] %v2946_v15 }
 0x3a8   :  { %v2817_v10 = vpop.f32.mrf.mxu0  ;;  %v2830_v12 = vpop.f32.mrf.mxu1 }
 0x3a9   :  { %v4285_v16 = vmul.f32 -1.442695, %v2803_v9 }
 0x3ab   :  { %4645 = vpow2.f32 %v4285_v16 }
 0x3ac   :  { %v2791_v18 = vpop.f32.mrf.mxu3 }
 0x3ad   :  { %v2804_v19 = vpop.f32.mrf.mxu2 }
 0x3b1   :  { %v4646_v14 = vpop.eup %4645 }
 0x3b2   :  { %v2871_v20 = vadd.f32 1.0, %v4646_v14 }
 0x3b4   :  { %4647 = vrcp.f32 %v2871_v20  ;;  %v2959_v40 = vand.u32 2147483648, %v2871_v20  ;;  %v2957_v27 = vand.u32 2147483647, %v2871_v20  ;;  %vm2953_vm8 = vweird.f32 %v2871_v20 }
 0x3b6   :  { %v2960_v32 = vor.u32 1.1754944e-38, %v2959_v40  ;;  %vm2958_vm10 = vcmp.eq.f32.partialorder %v2957_v27, 8.507059e+37 }
 0x3ba   :  { %v4648_v23 = vpop.eup %4647 }
 0x3bb   :  { %v2949_v24 = vmul.f32 %v4648_v23, %v2871_v20  ;;  %vm2954_vm7 = vweird.f32 %v4648_v23 }
 0x3bc   :  { %vm2955_vm9 = vmor %vm2953_vm8, %vm2954_vm7 }
 0x3bd   :  { %v2950_v25 = vsub.f32 1.0, %v2949_v24 }
 0x3bf   :  { %v2951_v26 = vmul.f32 %v4648_v23, %v2950_v25 }
 0x3c1   :  { %v2952_v29 = vadd.f32 %v4648_v23, %v2951_v26 }
 0x3c3   :  { %v2956_v35 = vsel %vm2955_vm9, %v4648_v23, %v2952_v29 }
 0x3c4   :  { %v2841_v33 = vpop.f32.mrf.mxu3  ;;  %v2961_v37 = vsel %vm2958_vm10, %v2960_v32, %v2956_v35 }
 0x3c5   :  { %v2842_v36 = vadd.f32 %v2841_v33, %v2829_v28  ;;  %2983 = vst [vmem:[#allocation2 + $0x28] sm:$0xff] %v2961_v37 }
 0x3c7   :  { %v4286_v17 = vmul.f32 -1.442695, %v2842_v36 }
 0x3c9   :  { %4649 = vpow2.f32 %v4286_v17 }
 0x3cc   :  { %v2843_v38 = vpop.f32.mrf.mxu3 }
 0x3cf   :  { %v4650_v39 = vpop.eup %4649 }
 0x3d0   :  { %v2872_v41 = vadd.f32 1.0, %v4650_v39 }
 0x3d2   :  { %4651 = vrcp.f32 %v2872_v41  ;;  %v2974_v52 = vand.u32 2147483648, %v2872_v41  ;;  %v2972_v46 = vand.u32 2147483647, %v2872_v41  ;;  %vm2968_vm12 = vweird.f32 %v2872_v41 }
 0x3d4   :  { %v2975_v34 = vor.u32 1.1754944e-38, %v2974_v52  ;;  %vm2973_vm14 = vcmp.eq.f32.partialorder %v2972_v46, 8.507059e+37 }
 0x3d8   :  { %v4652_v42 = vpop.eup %4651 }
 0x3d9   :  { %v2964_v43 = vmul.f32 %v4652_v42, %v2872_v41  ;;  %vm2969_vm11 = vweird.f32 %v4652_v42 }
 0x3da   :  { %vm2970_vm13 = vmor %vm2968_vm12, %vm2969_vm11 }
 0x3db   :  { %v2965_v44 = vsub.f32 1.0, %v2964_v43 }
 0x3dd   :  { %v2966_v45 = vmul.f32 %v4652_v42, %v2965_v44 }
 0x3df   :  { %v2967_v31 = vadd.f32 %v4652_v42, %v2966_v45 }
 0x3e1   :  { %v2971_v47 = vsel %vm2970_vm13, %v4652_v42, %v2967_v31 }
 0x3e2   :  { %v2976_v49 = vsel %vm2973_vm14, %v2975_v34, %v2971_v47 }
 0x3e3   :  { %2984 = vst.msk [vmem:[#allocation2 + $0x30] sm:$0xff] %vm1042_vm0, %v2976_v49 }
 0x3e4   :  { %3002 = dma.vmem_to_hbm [thread:$0]  %s2998_s9, 896, %s3000_s6, [#allocation3]  }
 0x3e5   :  { %4677 = dma.done.wait [#allocation3], 896  }
 0x3e6   :  { %4678 = vsyncadd [#allocation3], 4294966400 }
 0x3e7   :  { %3015 = vsyncpa [#allocation3], 1 }

</bundles_post_ra>
